<compile_context>
chip_gen: v6e
topology: v6e:2x2x1
jax: 0.10.0
libtpu: 0.0.40
codegen_flags: <defaults>
</compile_context>

<pallas_src>
import math

import numpy as np
import jax
import jax.numpy as jnp
from jax import lax
from jax.experimental import pallas as pl
from jax.experimental.pallas import tpu as pltpu

F32 = jnp.float32
BF16 = jnp.bfloat16

VMEM = pl.BlockSpec(memory_space=pltpu.MemorySpace.VMEM)
SMEM = pl.BlockSpec(memory_space=pltpu.MemorySpace.SMEM)

# ------------------------- module hyper-parameters -------------------------
N_LAYERS = 2
CS, CV = 8, 8                          # irreps_hidden = "8x0e + 8x1o"
XW = 4 * CS + 6 * CV                   # expanded node / message lane width (= 80)
EDGE_ATTR_DIM = 8
BONDED_DIM = EDGE_ATTR_DIM // 2        # embed_bondedness output dim
RADIAL_DIM = (EDGE_ATTR_DIM + 1) // 2  # soft_one_hot_linspace size
ATOM_EMB_DIM = 16                      # SimpleAtomEmbedding total dim, all 0e
NUM_ATOM_TYPES = 5
RADIAL_MLP_HIDDEN = 16
H_ALL = RADIAL_MLP_HIDDEN * (N_LAYERS + 1)   # fused radial-MLP hidden width

# canonical-32 channel layout [s(8) | v0(8) | v1(8) | v2(8)] expanded to the shared
# 80-lane layout [s, v0, v1, v2, v0, s, v1, s, v2, s] (so per-edge gathered features
# line up with the tensor-product message lanes with NO in-kernel lane shuffles).
_DUP_BLOCKS = (0, 1, 2, 3, 1, 0, 2, 0, 3, 0)
DUP_COLS = np.concatenate([np.arange(CS) + CS * b for b in _DUP_BLOCKS])


# ----------------------------- parameter slab layout ------------------------
def _param_layout():
    layout = {}
    row = [0]

    def add(name, nrows, ncols):
        layout[name] = (row[0], nrows, ncols)
        row[0] += nrows

    add("w2_init", RADIAL_MLP_HIDDEN, XW)
    for l in range(N_LAYERS):
        add(f"w2_l{l}", RADIAL_MLP_HIDDEN, XW)
    add("mix_init", XW, XW)
    for l in range(N_LAYERS):
        add(f"mix_l{l}", XW, XW)
    add("aemb", NUM_ATOM_TYPES, XW)
    add("b2_init", 1, XW)
    for l in range(N_LAYERS):
        add(f"b2_l{l}", 1, XW)
    add("mask_s", 1, XW)
    add("iscale", 1, XW)
    add("scale_w", N_LAYERS, XW)
    add("skip_w", N_LAYERS, XW)
    add("wout", 1, XW)
    add("sh_place", 4, XW)
    add("w1_rad", RADIAL_DIM, H_ALL)
    add("b1_eff", 1, H_ALL)
    add("bond_delta", 1, H_ALL)
    return layout, row[0]


PARAM_LAYOUT, PARAM_ROWS = _param_layout()
PARAM_COLS = XW


# ------------------------------ fused kernel -------------------------------
def make_e3conv_kernel(N, E, cutoff):
    """Fully-fused forward kernel for a fixed (N, E, cutoff)."""
    R = RADIAL_DIM
    step = float(cutoff) / (R + 1)       # e3nn soft_one_hot_linspace(cutoff=True) spacing
    inv_step = 1.0 / step
    sqrt3 = math.sqrt(3.0)

    def P(p_ref, name):
        r, nr, nc = PARAM_LAYOUT[name]
        return p_ref[r:r + nr, 0:nc]

    def kernel(scal_ref, pos_ref, idx_ref, p_ref, out_ref):
        c = scal_ref[0, 0]               # c_noise
        gain = scal_ref[0, 1]            # output_gain (learnable scalar)

        # ---- indices -> one-hot gather / scatter matrices (built in-register) ----
        src_col = idx_ref[0:E, 0:1]
        dst_col = idx_ref[0:E, 1:2]
        bond_col = idx_ref[0:E, 2:3].astype(F32)
        atom_col = idx_ref[0:N, 3:4]
        dst_row = idx_ref[E:E + 1, 0:E]

        lane_n_EN = lax.broadcasted_iota(jnp.int32, (E, N), 1)
        src_oh_f = (lane_n_EN == src_col).astype(F32)            # [E, N]
        dst_oh_f = (lane_n_EN == dst_col).astype(F32)            # [E, N]
        src_oh = src_oh_f.astype(BF16)                           # exact in bf16
        sub_n_NE = lax.broadcasted_iota(jnp.int32, (N, E), 0)
        dst_oh_t = (sub_n_NE == dst_row).astype(BF16)            # [N, E]
        atom_oh = (lax.broadcasted_iota(jnp.int32, (N, NUM_ATOM_TYPES), 1)
                   == atom_col).astype(F32)                      # [N, T]

        # ---- edge geometry (f32, rsqrt on the critical path) ----
        ev = jnp.dot(src_oh_f - dst_oh_f, pos_ref[...],
                     preferred_element_type=F32)                 # [E, 3]  pos[src]-pos[dst]
        nsq = jnp.sum(ev * ev, axis=-1, keepdims=True)
        inv_r = lax.rsqrt(jnp.maximum(nsq, 1e-12))
        r = nsq * inv_r
        # o3.SphericalHarmonics("1x0e+1x1o", normalize=True, normalization="component"):
        #   l=0 part == 1 (folded into conv weights), l=1 part == sqrt(3) * unit_vec.
        shv = ev * (sqrt3 * inv_r)                               # [E, 3]

        # Spherical-harmonic lane placement into the shared 80-lane message layout:
        #   sm = [1]*32 | sh_x*16 | sh_y*16 | sh_z*16       (one matmul, hoisted)
        shp = P(p_ref, "sh_place")                               # [4, XW]
        sm = shp[0:1, :] + jnp.dot(shv, shp[1:4, :], preferred_element_type=F32)

        # gaussian radial basis, e3nn soft_one_hot_linspace(basis='gaussian', cutoff=True)
        centers = (lax.broadcasted_iota(jnp.int32, (1, R), 1).astype(F32) + 1.0) * step
        d = (r - centers) * inv_step
        radial = jnp.exp(-(d * d)) * (1.0 / 1.12)                # [E, R]

        # ---- fused radial MLPs (init projector + all hidden layers), hoisted ----
        # bondedness embedding folded into b1_eff / bond_delta at packing time.
        h_pre = (jnp.dot(radial.astype(BF16), P(p_ref, "w1_rad").astype(BF16),
                         preferred_element_type=F32)
                 + P(p_ref, "b1_eff") + bond_col * P(p_ref, "bond_delta"))
        h16 = jax.nn.silu(h_pre).astype(BF16)                    # [E, H_ALL]

        w_sh = []                                                # per-block edge weights * SH
        for bi, nm in enumerate(["init"] + [f"l{l}" for l in range(N_LAYERS)]):
            hs = h16[:, bi * RADIAL_MLP_HIDDEN:(bi + 1) * RADIAL_MLP_HIDDEN]
            w = (jnp.dot(hs, P(p_ref, f"w2_{nm}").astype(BF16),
                         preferred_element_type=F32)
                 + P(p_ref, f"b2_{nm}"))                         # [E, XW], message-lane order
            w_sh.append(w * sm)

        # ---- node features: atom embedding + initial noise-conditional scaling ----
        x = jnp.dot(atom_oh, P(p_ref, "aemb"), preferred_element_type=F32)   # [N, XW]
        x = x * (1.0 + P(p_ref, "iscale") * c)

        mask_s = P(p_ref, "mask_s")                              # 1.0 on invariant (0e) lanes

        def conv(x_in, w_sh_l, mix_name):
            """One equivariant conv: gather -> TP messages -> scatter -> mix -> gate."""
            feat = jnp.dot(src_oh, x_in.astype(BF16),
                           preferred_element_type=F32)           # [E, XW]   gather
            msg = (w_sh_l * feat).astype(BF16)                   # [E, XW]   all TP paths
            agg = jnp.dot(dst_oh_t, msg, preferred_element_type=F32)   # [N, XW]  scatter-sum
            y = jnp.dot(agg.astype(BF16), P(p_ref, mix_name).astype(BF16),
                        preferred_element_type=F32)              # [N, XW]  (deg-norm folded in)
            # silu gate on the invariant lanes only (vector lanes pass through unchanged)
            return y * (1.0 + mask_s * (jax.nn.sigmoid(y) - 1.0))

        # initial projector: 16x0e -> 8x0e + 8x1o
        x = conv(x, w_sh[0], "mix_init")

        # hidden interaction blocks (python-unrolled)
        scale_w = P(p_ref, "scale_w")
        skip_w = P(p_ref, "skip_w")
        for l in range(N_LAYERS):
            # TODO(synk): NoiseConditionalScaling / NoiseConditionalSkipConnection source not
            # provided; modeled as learned per-irrep scalar functions of c_noise (equivariant).
            sw = scale_w[l:l + 1, :]
            kw = skip_w[l:l + 1, :]
            a = jax.nn.sigmoid(kw * c)
            b = jnp.sqrt(jnp.maximum(1.0 - a * a, 0.0))
            y = conv(x * (1.0 + sw * c), w_sh[1 + l], f"mix_l{l}")
            x = a * x + b * y

        # ---- output head: CV x 1o -> 1x1o, times output_gain ----
        row_i = lax.broadcasted_iota(jnp.int32, (XW, 3), 0)
        comp_i = lax.broadcasted_iota(jnp.int32, (XW, 3), 1)
        lo = (comp_i + 1) * CS
        sel3 = ((row_i >= lo) & (row_i < lo + CS)).astype(F32)   # picks canonical v0/v1/v2 lanes
        out_ref[...] = gain * jnp.dot(x * P(p_ref, "wout"), sel3,
                                      preferred_element_type=F32)            # [N, 3]

    return kernel


# -------------------------------- wrapper -----------------------------------
def e3conv_forward(param_slab, output_gain, pos, atom_type, src, dst, bond_mask,
                   c_noise, effective_radial_cutoff):
    N = pos.shape[0]
    E = src.shape[0]
    assert E >= 4 and N <= E, "index-slab packing assumes E >= 4 and N <= E"
    kernel = make_e3conv_kernel(N, E, effective_radial_cutoff)

    # single int32 index slab: columns [src, dst, bond, atom] + a dst row for the scatter one-hot
    idx = jnp.zeros((E + 1, E), jnp.int32)
    idx = idx.at[:E, 0].set(src.astype(jnp.int32))
    idx = idx.at[:E, 1].set(dst.astype(jnp.int32))
    idx = idx.at[:E, 2].set(bond_mask.astype(jnp.int32))
    idx = idx.at[:N, 3].set(atom_type.astype(jnp.int32))
    idx = idx.at[E, :].set(dst.astype(jnp.int32))

    scal = jnp.stack([jnp.asarray(c_noise, F32),
                      jnp.asarray(output_gain, F32)]).reshape(1, 2)

    mm = lambda m, k, n: 2 * m * k * n
    flops = (mm(E, N, 3) + mm(E, 3, XW) + mm(E, RADIAL_DIM, H_ALL)
             + (N_LAYERS + 1) * mm(E, RADIAL_MLP_HIDDEN, XW)
             + mm(N, NUM_ATOM_TYPES, XW)
             + (N_LAYERS + 1) * (mm(E, N, XW) + mm(N, E, XW) + mm(N, XW, XW))
             + mm(N, XW, 3) + 20 * (N + E) * XW)
    transcendentals = E * RADIAL_DIM + E * H_ALL + (N_LAYERS + 1) * N * XW + N_LAYERS * XW
    bytes_accessed = 4 * (PARAM_ROWS * PARAM_COLS + (E + 1) * E + N * 3 + N * 3 + 2)

    return pl.pallas_call(
        kernel,
        out_shape=jax.ShapeDtypeStruct((N, 3), F32),
        in_specs=[SMEM, VMEM, VMEM, VMEM],
        out_specs=VMEM,
        cost_estimate=pl.CostEstimate(flops=int(flops),
                                      transcendentals=int(transcendentals),
                                      bytes_accessed=int(bytes_accessed)),
    )(scal, pos.astype(F32), idx, param_slab)
    # TODO(synk): e3nn.util.test.assert_equivariant branch (test_equivariance=True) not reproduced.


# ----------------------------- parameter init -------------------------------
def init_params(key):
    """Canonical (unpacked) learnables, mirroring the PyTorch module."""
    keys = iter(jax.random.split(key, 96))

    def nrm(shape, scale=0.5):
        return scale * jax.random.normal(next(keys), shape, dtype=F32)

    params = {
        "bondedness_emb": nrm((2, BONDED_DIM)),                  # nn.Embedding(2, .)
        "atom_emb": nrm((NUM_ATOM_TYPES, ATOM_EMB_DIM)),         # SimpleAtomEmbedding
        "init_noise_scale_w": nrm((1, ATOM_EMB_DIM), 0.1),       # initial NoiseConditionalScaling
        "init_proj": {
            "W1": nrm((EDGE_ATTR_DIM, RADIAL_MLP_HIDDEN)),
            "b1": nrm((1, RADIAL_MLP_HIDDEN), 0.1),
            "W2_ss": nrm((RADIAL_MLP_HIDDEN, ATOM_EMB_DIM)),     # 0e x 0e -> 0e path weights
            "W2_sv": nrm((RADIAL_MLP_HIDDEN, ATOM_EMB_DIM)),     # 0e x 1o -> 1o path weights
            "b2_ss": nrm((1, ATOM_EMB_DIM), 0.1),
            "b2_sv": nrm((1, ATOM_EMB_DIM), 0.1),
            "L_ss": nrm((ATOM_EMB_DIM, CS)),                     # scalar-output mixing
            "L_sv": nrm((ATOM_EMB_DIM, CV)),                     # vector-output mixing
        },
        "layers": [],
        "out_head_w": nrm((CV, 1)),
        "output_gain": jnp.float32(0.0),                         # torch.nn.Parameter(tensor(0.0))
    }
    for _ in range(N_LAYERS):
        params["layers"].append({
            "W1": nrm((EDGE_ATTR_DIM, RADIAL_MLP_HIDDEN)),
            "b1": nrm((1, RADIAL_MLP_HIDDEN), 0.1),
            "W2_ss": nrm((RADIAL_MLP_HIDDEN, CS)),
            "W2_sv": nrm((RADIAL_MLP_HIDDEN, CS)),
            "W2_vv": nrm((RADIAL_MLP_HIDDEN, CV)),
            "W2_vs": nrm((RADIAL_MLP_HIDDEN, CV)),
            "b2_ss": nrm((1, CS), 0.1), "b2_sv": nrm((1, CS), 0.1),
            "b2_vv": nrm((1, CV), 0.1), "b2_vs": nrm((1, CV), 0.1),
            "M_ss": nrm((CS, CS)),   # 0e x 0e -> 0e mixing
            "M_vs": nrm((CV, CV)),   # 1o x 0e -> 1o mixing
            "M_vv": nrm((CV, CS)),   # 1o x 1o -> 0e mixing
            "M_sv": nrm((CS, CV)),   # 0e x 1o -> 1o mixing
            "noise_scale_s": nrm((1, CS), 0.1),
            "noise_scale_v": nrm((1, CV), 0.1),
            "skip_s": nrm((1, CS), 0.5),
            "skip_v": nrm((1, CV), 0.5),
        })
    return params


def pack_params(params, avg_degree):
    """Pack all learnables into one lane-dense f32 slab in the kernel's expanded layouts."""
    # TODO(synk): NequIP normally uses a fixed avg_num_neighbors hyperparameter; here the
    # current graph's average degree is baked in at packing time (same as the reference run).
    deg_norm = 1.0 / math.sqrt(max(float(avg_degree), 1.0))
    inv_sqrt3 = 1.0 / math.sqrt(3.0)
    A = lambda t: np.asarray(t, np.float32)
    dup = DUP_COLS
    slab = np.zeros((PARAM_ROWS, PARAM_COLS), np.float32)

    def put(name, arr):
        r, nr, nc = PARAM_LAYOUT[name]
        a = np.asarray(arr, np.float32)
        assert a.shape == (nr, nc), (name, a.shape, (nr, nc))
        slab[r:r + nr, 0:nc] = a

    # fused radial MLP: W1 stacked over (init, layer0, layer1), bondedness folded into biases
    blocks = [params["init_proj"]] + list(params["layers"])
    W1_all = np.concatenate([A(b["W1"]) for b in blocks], axis=1)        # [8, 48]
    b1_all = np.concatenate([A(b["b1"]) for b in blocks], axis=1)        # [1, 48]
    bemb = A(params["bondedness_emb"])
    W1_bond, W1_radial = W1_all[:BONDED_DIM], W1_all[BONDED_DIM:]
    row0, row1 = bemb[0:1] @ W1_bond, bemb[1:2] @ W1_bond
    put("w1_rad", W1_radial)
    put("b1_eff", b1_all + row0)
    put("bond_delta", row1 - row0)

    # initial projector (scalar-only input; lane layout [xs0 | 0 | xs0 | xs0 | xs0])
    ip = params["init_proj"]
    z = np.zeros((RADIAL_MLP_HIDDEN, ATOM_EMB_DIM), np.float32)
    put("w2_init", np.concatenate(
        [A(ip["W2_ss"]), z, A(ip["W2_sv"]), A(ip["W2_sv"]), A(ip["W2_sv"])], axis=1))
    zb = np.zeros((1, ATOM_EMB_DIM), np.float32)
    put("b2_init", np.concatenate(
        [A(ip["b2_ss"]), zb, A(ip["b2_sv"]), A(ip["b2_sv"]), A(ip["b2_sv"])], axis=1))
    Mi = np.zeros((XW, 4 * CS), np.float32)
    Mi[0:16, 0:8] = A(ip["L_ss"])
    Mi[32:48, 8:16] = A(ip["L_sv"])
    Mi[48:64, 16:24] = A(ip["L_sv"])
    Mi[64:80, 24:32] = A(ip["L_sv"])
    put("mix_init", deg_norm * Mi[:, dup])

    # hidden layers: W2 / b2 columns in message-lane order, block-structured Mix
    sw = np.zeros((N_LAYERS, 4 * CS), np.float32)
    kw = np.zeros((N_LAYERS, 4 * CS), np.float32)
    for l, lp in enumerate(params["layers"]):
        put(f"w2_l{l}", np.concatenate(
            [A(lp["W2_ss"]), A(lp["W2_vs"]), A(lp["W2_vs"]), A(lp["W2_vs"]),
             A(lp["W2_vv"]), A(lp["W2_sv"]), A(lp["W2_vv"]), A(lp["W2_sv"]),
             A(lp["W2_vv"]), A(lp["W2_sv"])], axis=1))
        put(f"b2_l{l}", np.concatenate(
            [A(lp["b2_ss"]), A(lp["b2_vs"]), A(lp["b2_vs"]), A(lp["b2_vs"]),
             A(lp["b2_vv"]), A(lp["b2_sv"]), A(lp["b2_vv"]), A(lp["b2_sv"]),
             A(lp["b2_vv"]), A(lp["b2_sv"])], axis=1))
        M = np.zeros((XW, 4 * CS), np.float32)
        M[0:8, 0:8] = A(lp["M_ss"])
        M[8:16, 8:16] = A(lp["M_vs"])
        M[16:24, 16:24] = A(lp["M_vs"])
        M[24:32, 24:32] = A(lp["M_vs"])
        M[32:40, 0:8] = inv_sqrt3 * A(lp["M_vv"])
        M[40:48, 8:16] = A(lp["M_sv"])
        M[48:56, 0:8] = inv_sqrt3 * A(lp["M_vv"])
        M[56:64, 16:24] = A(lp["M_sv"])
        M[64:72, 0:8] = inv_sqrt3 * A(lp["M_vv"])
        M[72:80, 24:32] = A(lp["M_sv"])
        put(f"mix_l{l}", deg_norm * M[:, dup])

        sw[l] = np.concatenate([A(lp["noise_scale_s"]), A(lp["noise_scale_v"]),
                                A(lp["noise_scale_v"]), A(lp["noise_scale_v"])], axis=1)[0]
        kw[l] = np.concatenate([A(lp["skip_s"]), A(lp["skip_v"]),
                                A(lp["skip_v"]), A(lp["skip_v"])], axis=1)[0]
    put("scale_w", sw[:, dup])
    put("skip_w", kw[:, dup])

    # atom embedding + initial noise scaling (init-projector input layout)
    ae = A(params["atom_emb"])
    zA = np.zeros_like(ae)
    put("aemb", np.concatenate([ae, zA, ae, ae, ae], axis=1))
    isc = A(params["init_noise_scale_w"])
    put("iscale", np.concatenate([isc, np.zeros_like(isc), isc, isc, isc], axis=1))

    # invariant-lane mask for the silu gate
    mask = np.zeros((1, 4 * CS), np.float32)
    mask[0, :CS] = 1.0
    put("mask_s", mask[:, dup])

    # spherical-harmonic lane placement rows
    shp = np.zeros((4, XW), np.float32)
    shp[0, 0:32] = 1.0
    shp[1, 32:48] = 1.0
    shp[2, 48:64] = 1.0
    shp[3, 64:80] = 1.0
    put("sh_place", shp)

    # output head: same per-channel weights on the x/y/z component lanes (equivariant)
    wo = np.zeros((1, 4 * CS), np.float32)
    for k in range(3):
        wo[0, CS * (k + 1):CS * (k + 2)] = A(params["out_head_w"])[:, 0]
    put("wout", wo[:, dup])

    return jnp.asarray(slab)


# ----------------------------------- main -----------------------------------
if __name__ == "__main__":
    key = jax.random.PRNGKey(0)
    pkey, poskey = jax.random.split(key)
    params = init_params(pkey)

    # The PyTorch module initializes output_gain to 0.0 (which would make the output
    # identically zero and the check below vacuous); since it is a learnable scalar we
    # use a nonzero value here so the equivariant feature path is actually exercised.
    output_gain = jnp.float32(0.1)

    N = 16
    pos = 2.0 * jax.random.normal(poskey, (N, 3), dtype=F32)
    atom_type = (jnp.arange(N, dtype=jnp.int32) % NUM_ATOM_TYPES)
    # deterministic small graph: each node connects to (i+1)%N, (i+2)%N, (i+3)%N
    src = jnp.array([i for i in range(N) for j in (1, 2, 3)], dtype=jnp.int32)
    dst = jnp.array([(i + j) % N for i in range(N) for j in (1, 2, 3)], dtype=jnp.int32)
    bond_mask = jnp.array([1 if j == 1 else 0 for i in range(N) for j in (1, 2, 3)],
                          dtype=jnp.int32)
    E = int(src.shape[0])
    c_noise = jnp.float32(0.5)
    effective_radial_cutoff = 4.0

    param_slab = pack_params(params, avg_degree=E / N)

    fwd = jax.jit(e3conv_forward, static_argnums=(8,))
    new_pos = fwd(param_slab, output_gain, pos, atom_type, src, dst, bond_mask,
                  c_noise, effective_radial_cutoff)
    jax.block_until_ready(new_pos)
    assert new_pos.shape == (N, 3) and new_pos.dtype == jnp.float32
    assert bool(jnp.all(jnp.isfinite(new_pos)))
    assert bool(jnp.any(jnp.abs(new_pos) > 0.0))
    print("KERNEL_OK")
</pallas_src>

<mosaic_0001>
module attributes {stable_mosaic.version = 11 : i64} {
  func.func @kernel(%arg0: memref<1x2xf32, #tpu.memory_space<smem>>, %arg1: memref<16x3xf32, #tpu.memory_space<vmem>>, %arg2: memref<49x48xi32, #tpu.memory_space<vmem>>, %arg3: memref<313x80xf32, #tpu.memory_space<vmem>>, %arg4: memref<16x3xf32, #tpu.memory_space<vmem>>) attributes {dimension_semantics = [], scalar_prefetch = 0 : i64, scratch_operands = 0 : i64, tpu.core_type = #tpu.core_type<tc>} {
    %c0 = arith.constant 0 : index
    %c0_0 = arith.constant 0 : index
    %0 = memref.load %arg0[%c0, %c0_0] : memref<1x2xf32, #tpu.memory_space<smem>>
    %c0_1 = arith.constant 0 : index
    %c1 = arith.constant 1 : index
    %1 = memref.load %arg0[%c0_1, %c1] : memref<1x2xf32, #tpu.memory_space<smem>>
    %c0_2 = arith.constant 0 : index
    %c0_3 = arith.constant 0 : index
    %2 = vector.load %arg2[%c0_2, %c0_3] : memref<49x48xi32, #tpu.memory_space<vmem>>, vector<48x1xi32>
    %c0_4 = arith.constant 0 : index
    %c1_5 = arith.constant 1 : index
    %3 = vector.load %arg2[%c0_4, %c1_5] : memref<49x48xi32, #tpu.memory_space<vmem>>, vector<48x1xi32>
    %c0_6 = arith.constant 0 : index
    %c2 = arith.constant 2 : index
    %4 = vector.load %arg2[%c0_6, %c2] : memref<49x48xi32, #tpu.memory_space<vmem>>, vector<48x1xi32>
    %5 = arith.sitofp %4 : vector<48x1xi32> to vector<48x1xf32>
    %c0_7 = arith.constant 0 : index
    %c3 = arith.constant 3 : index
    %6 = vector.load %arg2[%c0_7, %c3] : memref<49x48xi32, #tpu.memory_space<vmem>>, vector<16x1xi32>
    %c48 = arith.constant 48 : index
    %c0_8 = arith.constant 0 : index
    %7 = vector.load %arg2[%c48, %c0_8] : memref<49x48xi32, #tpu.memory_space<vmem>>, vector<1x48xi32>
    %8 = tpu.iota {dimensions = array<i32: 1>} : vector<48x16xi32>
    %9 = vector.broadcast %2 : vector<48x1xi32> to vector<48x16xi32>
    %10 = arith.cmpi eq, %8, %9 : vector<48x16xi32>
    %11 = arith.extui %10 : vector<48x16xi1> to vector<48x16xi32>
    %12 = arith.sitofp %11 : vector<48x16xi32> to vector<48x16xf32>
    %13 = vector.broadcast %3 : vector<48x1xi32> to vector<48x16xi32>
    %14 = arith.cmpi eq, %8, %13 : vector<48x16xi32>
    %15 = arith.extui %14 : vector<48x16xi1> to vector<48x16xi32>
    %16 = arith.sitofp %15 : vector<48x16xi32> to vector<48x16xf32>
    %17 = arith.truncf %12 : vector<48x16xf32> to vector<48x16xbf16>
    %18 = tpu.iota {dimensions = array<i32: 0>} : vector<16x48xi32>
    %19 = vector.broadcast %7 : vector<1x48xi32> to vector<16x48xi32>
    %20 = arith.cmpi eq, %18, %19 : vector<16x48xi32>
    %21 = arith.extui %20 : vector<16x48xi1> to vector<16x48xi32>
    %22 = arith.sitofp %21 : vector<16x48xi32> to vector<16x48xf32>
    %23 = arith.truncf %22 : vector<16x48xf32> to vector<16x48xbf16>
    %24 = tpu.iota {dimensions = array<i32: 1>} : vector<16x5xi32>
    %25 = vector.broadcast %6 : vector<16x1xi32> to vector<16x5xi32>
    %26 = arith.cmpi eq, %24, %25 : vector<16x5xi32>
    %27 = arith.extui %26 : vector<16x5xi1> to vector<16x5xi32>
    %28 = arith.sitofp %27 : vector<16x5xi32> to vector<16x5xf32>
    %29 = arith.subf %12, %16 : vector<48x16xf32>
    %c0_9 = arith.constant 0 : index
    %c0_10 = arith.constant 0 : index
    %30 = vector.load %arg1[%c0_9, %c0_10] : memref<16x3xf32, #tpu.memory_space<vmem>>, vector<16x3xf32>
    %cst = arith.constant dense<0.000000e+00> : vector<48x3xf32>
    %31 = tpu.matmul %29, %30, %cst {dimension_numbers = #tpu.dot_dimension_numbers<[1], [0], [0], [1], [0, 0, 1, 1], [], []>} : vector<48x16xf32>, vector<16x3xf32>, vector<48x3xf32> -> vector<48x3xf32>
    %32 = arith.mulf %31, %31 : vector<48x3xf32>
    %cst_11 = arith.constant dense<0.000000e+00> : vector<48xf32>
    %33 = vector.multi_reduction <add>, %32, %cst_11 [1] : vector<48x3xf32> to vector<48xf32>
    %34 = vector.shape_cast %33 : vector<48xf32> to vector<48x1xf32>
    %cst_12 = arith.constant 9.99999996E-13 : f32
    %35 = vector.broadcast %cst_12 : f32 to vector<48x1xf32>
    %36 = arith.maximumf %34, %35 : vector<48x1xf32>
    %37 = math.rsqrt %36 : vector<48x1xf32>
    %38 = arith.mulf %34, %37 : vector<48x1xf32>
    %cst_13 = arith.constant 1.73205078 : f32
    %39 = vector.broadcast %cst_13 : f32 to vector<48x1xf32>
    %40 = arith.mulf %39, %37 : vector<48x1xf32>
    %41 = vector.broadcast %40 : vector<48x1xf32> to vector<48x3xf32>
    %42 = arith.mulf %31, %41 : vector<48x3xf32>
    %c303 = arith.constant 303 : index
    %c0_14 = arith.constant 0 : index
    %43 = vector.load %arg3[%c303, %c0_14] : memref<313x80xf32, #tpu.memory_space<vmem>>, vector<4x80xf32>
    %44 = vector.extract_strided_slice %43 {offsets = [0, 0], sizes = [1, 80], strides = [1, 1]} : vector<4x80xf32> to vector<1x80xf32>
    %45 = vector.extract_strided_slice %43 {offsets = [1, 0], sizes = [3, 80], strides = [1, 1]} : vector<4x80xf32> to vector<3x80xf32>
    %cst_15 = arith.constant dense<0.000000e+00> : vector<48x80xf32>
    %46 = tpu.matmul %42, %45, %cst_15 {dimension_numbers = #tpu.dot_dimension_numbers<[1], [0], [0], [1], [0, 0, 1, 1], [], []>} : vector<48x3xf32>, vector<3x80xf32>, vector<48x80xf32> -> vector<48x80xf32>
    %47 = vector.broadcast %44 : vector<1x80xf32> to vector<48x80xf32>
    %48 = arith.addf %47, %46 : vector<48x80xf32>
    %49 = tpu.iota {dimensions = array<i32: 1>} : vector<1x4xi32>
    %50 = arith.sitofp %49 : vector<1x4xi32> to vector<1x4xf32>
    %cst_16 = arith.constant 1.000000e+00 : f32
    %51 = vector.broadcast %cst_16 : f32 to vector<1x4xf32>
    %52 = arith.addf %50, %51 : vector<1x4xf32>
    %cst_17 = arith.constant 8.000000e-01 : f32
    %53 = vector.broadcast %cst_17 : f32 to vector<1x4xf32>
    %54 = arith.mulf %52, %53 : vector<1x4xf32>
    %55 = vector.broadcast %38 : vector<48x1xf32> to vector<48x4xf32>
    %56 = vector.broadcast %54 : vector<1x4xf32> to vector<48x4xf32>
    %57 = arith.subf %55, %56 : vector<48x4xf32>
    %cst_18 = arith.constant 1.250000e+00 : f32
    %58 = vector.broadcast %cst_18 : f32 to vector<48x4xf32>
    %59 = arith.mulf %57, %58 : vector<48x4xf32>
    %60 = arith.mulf %59, %59 : vector<48x4xf32>
    %cst_19 = arith.constant 0.000000e+00 : f32
    %61 = vector.broadcast %cst_19 : f32 to vector<48x4xf32>
    %62 = arith.subf %61, %60 : vector<48x4xf32>
    %63 = math.exp %62 : vector<48x4xf32>
    %cst_20 = arith.constant 0.892857134 : f32
    %64 = vector.broadcast %cst_20 : f32 to vector<48x4xf32>
    %65 = arith.mulf %63, %64 : vector<48x4xf32>
    %66 = arith.truncf %65 : vector<48x4xf32> to vector<48x4xbf16>
    %c307 = arith.constant 307 : index
    %c0_21 = arith.constant 0 : index
    %67 = vector.load %arg3[%c307, %c0_21] : memref<313x80xf32, #tpu.memory_space<vmem>>, vector<4x48xf32>
    %68 = arith.truncf %67 : vector<4x48xf32> to vector<4x48xbf16>
    %cst_22 = arith.constant dense<0.000000e+00> : vector<48x48xf32>
    %69 = tpu.matmul %66, %68, %cst_22 {dimension_numbers = #tpu.dot_dimension_numbers<[1], [0], [0], [1], [0, 0, 1, 1], [], []>} : vector<48x4xbf16>, vector<4x48xbf16>, vector<48x48xf32> -> vector<48x48xf32>
    %c311 = arith.constant 311 : index
    %c0_23 = arith.constant 0 : index
    %70 = vector.load %arg3[%c311, %c0_23] : memref<313x80xf32, #tpu.memory_space<vmem>>, vector<1x48xf32>
    %71 = vector.broadcast %70 : vector<1x48xf32> to vector<48x48xf32>
    %72 = arith.addf %69, %71 : vector<48x48xf32>
    %c312 = arith.constant 312 : index
    %c0_24 = arith.constant 0 : index
    %73 = vector.load %arg3[%c312, %c0_24] : memref<313x80xf32, #tpu.memory_space<vmem>>, vector<1x48xf32>
    %74 = vector.broadcast %5 : vector<48x1xf32> to vector<48x48xf32>
    %75 = vector.broadcast %73 : vector<1x48xf32> to vector<48x48xf32>
    %76 = arith.mulf %74, %75 : vector<48x48xf32>
    %77 = arith.addf %72, %76 : vector<48x48xf32>
    %78 = arith.negf %77 : vector<48x48xf32>
    %79 = math.exp %78 : vector<48x48xf32>
    %cst_25 = arith.constant 1.000000e+00 : f32
    %80 = vector.broadcast %cst_25 : f32 to vector<48x48xf32>
    %81 = arith.addf %80, %79 : vector<48x48xf32>
    %82 = arith.divf %80, %81 : vector<48x48xf32>
    %83 = arith.mulf %77, %82 : vector<48x48xf32>
    %84 = arith.truncf %83 : vector<48x48xf32> to vector<48x48xbf16>
    %85 = vector.extract_strided_slice %84 {offsets = [0, 0], sizes = [48, 16], strides = [1, 1]} : vector<48x48xbf16> to vector<48x16xbf16>
    %c0_26 = arith.constant 0 : index
    %c0_27 = arith.constant 0 : index
    %86 = vector.load %arg3[%c0_26, %c0_27] : memref<313x80xf32, #tpu.memory_space<vmem>>, vector<16x80xf32>
    %87 = arith.truncf %86 : vector<16x80xf32> to vector<16x80xbf16>
    %cst_28 = arith.constant dense<0.000000e+00> : vector<48x80xf32>
    %88 = tpu.matmul %85, %87, %cst_28 {dimension_numbers = #tpu.dot_dimension_numbers<[1], [0], [0], [1], [0, 0, 1, 1], [], []>} : vector<48x16xbf16>, vector<16x80xbf16>, vector<48x80xf32> -> vector<48x80xf32>
    %c293 = arith.constant 293 : index
    %c0_29 = arith.constant 0 : index
    %89 = vector.load %arg3[%c293, %c0_29] : memref<313x80xf32, #tpu.memory_space<vmem>>, vector<1x80xf32>
    %90 = vector.broadcast %89 : vector<1x80xf32> to vector<48x80xf32>
    %91 = arith.addf %88, %90 : vector<48x80xf32>
    %92 = arith.mulf %91, %48 : vector<48x80xf32>
    %93 = vector.extract_strided_slice %84 {offsets = [0, 16], sizes = [48, 16], strides = [1, 1]} : vector<48x48xbf16> to vector<48x16xbf16>
    %c16 = arith.constant 16 : index
    %c0_30 = arith.constant 0 : index
    %94 = vector.load %arg3[%c16, %c0_30] : memref<313x80xf32, #tpu.memory_space<vmem>>, vector<16x80xf32>
    %95 = arith.truncf %94 : vector<16x80xf32> to vector<16x80xbf16>
    %cst_31 = arith.constant dense<0.000000e+00> : vector<48x80xf32>
    %96 = tpu.matmul %93, %95, %cst_31 {dimension_numbers = #tpu.dot_dimension_numbers<[1], [0], [0], [1], [0, 0, 1, 1], [], []>} : vector<48x16xbf16>, vector<16x80xbf16>, vector<48x80xf32> -> vector<48x80xf32>
    %c294 = arith.constant 294 : index
    %c0_32 = arith.constant 0 : index
    %97 = vector.load %arg3[%c294, %c0_32] : memref<313x80xf32, #tpu.memory_space<vmem>>, vector<1x80xf32>
    %98 = vector.broadcast %97 : vector<1x80xf32> to vector<48x80xf32>
    %99 = arith.addf %96, %98 : vector<48x80xf32>
    %100 = arith.mulf %99, %48 : vector<48x80xf32>
    %101 = vector.extract_strided_slice %84 {offsets = [0, 32], sizes = [48, 16], strides = [1, 1]} : vector<48x48xbf16> to vector<48x16xbf16>
    %c32 = arith.constant 32 : index
    %c0_33 = arith.constant 0 : index
    %102 = vector.load %arg3[%c32, %c0_33] : memref<313x80xf32, #tpu.memory_space<vmem>>, vector<16x80xf32>
    %103 = arith.truncf %102 : vector<16x80xf32> to vector<16x80xbf16>
    %cst_34 = arith.constant dense<0.000000e+00> : vector<48x80xf32>
    %104 = tpu.matmul %101, %103, %cst_34 {dimension_numbers = #tpu.dot_dimension_numbers<[1], [0], [0], [1], [0, 0, 1, 1], [], []>} : vector<48x16xbf16>, vector<16x80xbf16>, vector<48x80xf32> -> vector<48x80xf32>
    %c295 = arith.constant 295 : index
    %c0_35 = arith.constant 0 : index
    %105 = vector.load %arg3[%c295, %c0_35] : memref<313x80xf32, #tpu.memory_space<vmem>>, vector<1x80xf32>
    %106 = vector.broadcast %105 : vector<1x80xf32> to vector<48x80xf32>
    %107 = arith.addf %104, %106 : vector<48x80xf32>
    %108 = arith.mulf %107, %48 : vector<48x80xf32>
    %c288 = arith.constant 288 : index
    %c0_36 = arith.constant 0 : index
    %109 = vector.load %arg3[%c288, %c0_36] : memref<313x80xf32, #tpu.memory_space<vmem>>, vector<5x80xf32>
    %cst_37 = arith.constant dense<0.000000e+00> : vector<16x80xf32>
    %110 = tpu.matmul %28, %109, %cst_37 {dimension_numbers = #tpu.dot_dimension_numbers<[1], [0], [0], [1], [0, 0, 1, 1], [], []>} : vector<16x5xf32>, vector<5x80xf32>, vector<16x80xf32> -> vector<16x80xf32>
    %c297 = arith.constant 297 : index
    %c0_38 = arith.constant 0 : index
    %111 = vector.load %arg3[%c297, %c0_38] : memref<313x80xf32, #tpu.memory_space<vmem>>, vector<1x80xf32>
    %112 = vector.broadcast %0 : f32 to vector<1x80xf32>
    %113 = arith.mulf %111, %112 : vector<1x80xf32>
    %cst_39 = arith.constant 1.000000e+00 : f32
    %114 = vector.broadcast %cst_39 : f32 to vector<1x80xf32>
    %115 = arith.addf %114, %113 : vector<1x80xf32>
    %116 = vector.broadcast %115 : vector<1x80xf32> to vector<16x80xf32>
    %117 = arith.mulf %110, %116 : vector<16x80xf32>
    %c296 = arith.constant 296 : index
    %c0_40 = arith.constant 0 : index
    %118 = vector.load %arg3[%c296, %c0_40] : memref<313x80xf32, #tpu.memory_space<vmem>>, vector<1x80xf32>
    %119 = arith.truncf %117 : vector<16x80xf32> to vector<16x80xbf16>
    %cst_41 = arith.constant dense<0.000000e+00> : vector<48x80xf32>
    %120 = tpu.matmul %17, %119, %cst_41 {dimension_numbers = #tpu.dot_dimension_numbers<[1], [0], [0], [1], [0, 0, 1, 1], [], []>} : vector<48x16xbf16>, vector<16x80xbf16>, vector<48x80xf32> -> vector<48x80xf32>
    %121 = arith.mulf %92, %120 : vector<48x80xf32>
    %122 = arith.truncf %121 : vector<48x80xf32> to vector<48x80xbf16>
    %cst_42 = arith.constant dense<0.000000e+00> : vector<16x80xf32>
    %123 = tpu.matmul %23, %122, %cst_42 {dimension_numbers = #tpu.dot_dimension_numbers<[1], [0], [0], [1], [0, 0, 1, 1], [], []>} : vector<16x48xbf16>, vector<48x80xbf16>, vector<16x80xf32> -> vector<16x80xf32>
    %124 = arith.truncf %123 : vector<16x80xf32> to vector<16x80xbf16>
    %c48_43 = arith.constant 48 : index
    %c0_44 = arith.constant 0 : index
    %125 = vector.load %arg3[%c48_43, %c0_44] : memref<313x80xf32, #tpu.memory_space<vmem>>, vector<80x80xf32>
    %126 = arith.truncf %125 : vector<80x80xf32> to vector<80x80xbf16>
    %cst_45 = arith.constant dense<0.000000e+00> : vector<16x80xf32>
    %127 = tpu.matmul %124, %126, %cst_45 {dimension_numbers = #tpu.dot_dimension_numbers<[1], [0], [0], [1], [0, 0, 1, 1], [], []>} : vector<16x80xbf16>, vector<80x80xbf16>, vector<16x80xf32> -> vector<16x80xf32>
    %128 = arith.negf %127 : vector<16x80xf32>
    %129 = math.exp %128 : vector<16x80xf32>
    %cst_46 = arith.constant 1.000000e+00 : f32
    %130 = vector.broadcast %cst_46 : f32 to vector<16x80xf32>
    %131 = arith.addf %130, %129 : vector<16x80xf32>
    %132 = arith.divf %130, %131 : vector<16x80xf32>
    %cst_47 = arith.constant 1.000000e+00 : f32
    %133 = vector.broadcast %cst_47 : f32 to vector<16x80xf32>
    %134 = arith.subf %132, %133 : vector<16x80xf32>
    %135 = vector.broadcast %118 : vector<1x80xf32> to vector<16x80xf32>
    %136 = arith.mulf %135, %134 : vector<16x80xf32>
    %cst_48 = arith.constant 1.000000e+00 : f32
    %137 = vector.broadcast %cst_48 : f32 to vector<16x80xf32>
    %138 = arith.addf %137, %136 : vector<16x80xf32>
    %139 = arith.mulf %127, %138 : vector<16x80xf32>
    %c298 = arith.constant 298 : index
    %c0_49 = arith.constant 0 : index
    %140 = vector.load %arg3[%c298, %c0_49] : memref<313x80xf32, #tpu.memory_space<vmem>>, vector<2x80xf32>
    %c300 = arith.constant 300 : index
    %c0_50 = arith.constant 0 : index
    %141 = vector.load %arg3[%c300, %c0_50] : memref<313x80xf32, #tpu.memory_space<vmem>>, vector<2x80xf32>
    %142 = vector.extract_strided_slice %140 {offsets = [0, 0], sizes = [1, 80], strides = [1, 1]} : vector<2x80xf32> to vector<1x80xf32>
    %143 = vector.extract_strided_slice %141 {offsets = [0, 0], sizes = [1, 80], strides = [1, 1]} : vector<2x80xf32> to vector<1x80xf32>
    %144 = vector.broadcast %0 : f32 to vector<1x80xf32>
    %145 = arith.mulf %143, %144 : vector<1x80xf32>
    %146 = arith.negf %145 : vector<1x80xf32>
    %147 = math.exp %146 : vector<1x80xf32>
    %cst_51 = arith.constant 1.000000e+00 : f32
    %148 = vector.broadcast %cst_51 : f32 to vector<1x80xf32>
    %149 = arith.addf %148, %147 : vector<1x80xf32>
    %150 = arith.divf %148, %149 : vector<1x80xf32>
    %151 = arith.mulf %150, %150 : vector<1x80xf32>
    %cst_52 = arith.constant 1.000000e+00 : f32
    %152 = vector.broadcast %cst_52 : f32 to vector<1x80xf32>
    %153 = arith.subf %152, %151 : vector<1x80xf32>
    %cst_53 = arith.constant 0.000000e+00 : f32
    %154 = vector.broadcast %cst_53 : f32 to vector<1x80xf32>
    %155 = arith.maximumf %153, %154 : vector<1x80xf32>
    %156 = math.sqrt %155 : vector<1x80xf32>
    %157 = vector.broadcast %0 : f32 to vector<1x80xf32>
    %158 = arith.mulf %142, %157 : vector<1x80xf32>
    %cst_54 = arith.constant 1.000000e+00 : f32
    %159 = vector.broadcast %cst_54 : f32 to vector<1x80xf32>
    %160 = arith.addf %159, %158 : vector<1x80xf32>
    %161 = vector.broadcast %160 : vector<1x80xf32> to vector<16x80xf32>
    %162 = arith.mulf %139, %161 : vector<16x80xf32>
    %163 = arith.truncf %162 : vector<16x80xf32> to vector<16x80xbf16>
    %cst_55 = arith.constant dense<0.000000e+00> : vector<48x80xf32>
    %164 = tpu.matmul %17, %163, %cst_55 {dimension_numbers = #tpu.dot_dimension_numbers<[1], [0], [0], [1], [0, 0, 1, 1], [], []>} : vector<48x16xbf16>, vector<16x80xbf16>, vector<48x80xf32> -> vector<48x80xf32>
    %165 = arith.mulf %100, %164 : vector<48x80xf32>
    %166 = arith.truncf %165 : vector<48x80xf32> to vector<48x80xbf16>
    %cst_56 = arith.constant dense<0.000000e+00> : vector<16x80xf32>
    %167 = tpu.matmul %23, %166, %cst_56 {dimension_numbers = #tpu.dot_dimension_numbers<[1], [0], [0], [1], [0, 0, 1, 1], [], []>} : vector<16x48xbf16>, vector<48x80xbf16>, vector<16x80xf32> -> vector<16x80xf32>
    %168 = arith.truncf %167 : vector<16x80xf32> to vector<16x80xbf16>
    %c128 = arith.constant 128 : index
    %c0_57 = arith.constant 0 : index
    %169 = vector.load %arg3[%c128, %c0_57] : memref<313x80xf32, #tpu.memory_space<vmem>>, vector<80x80xf32>
    %170 = arith.truncf %169 : vector<80x80xf32> to vector<80x80xbf16>
    %cst_58 = arith.constant dense<0.000000e+00> : vector<16x80xf32>
    %171 = tpu.matmul %168, %170, %cst_58 {dimension_numbers = #tpu.dot_dimension_numbers<[1], [0], [0], [1], [0, 0, 1, 1], [], []>} : vector<16x80xbf16>, vector<80x80xbf16>, vector<16x80xf32> -> vector<16x80xf32>
    %172 = arith.negf %171 : vector<16x80xf32>
    %173 = math.exp %172 : vector<16x80xf32>
    %cst_59 = arith.constant 1.000000e+00 : f32
    %174 = vector.broadcast %cst_59 : f32 to vector<16x80xf32>
    %175 = arith.addf %174, %173 : vector<16x80xf32>
    %176 = arith.divf %174, %175 : vector<16x80xf32>
    %cst_60 = arith.constant 1.000000e+00 : f32
    %177 = vector.broadcast %cst_60 : f32 to vector<16x80xf32>
    %178 = arith.subf %176, %177 : vector<16x80xf32>
    %179 = vector.broadcast %118 : vector<1x80xf32> to vector<16x80xf32>
    %180 = arith.mulf %179, %178 : vector<16x80xf32>
    %cst_61 = arith.constant 1.000000e+00 : f32
    %181 = vector.broadcast %cst_61 : f32 to vector<16x80xf32>
    %182 = arith.addf %181, %180 : vector<16x80xf32>
    %183 = arith.mulf %171, %182 : vector<16x80xf32>
    %184 = vector.broadcast %150 : vector<1x80xf32> to vector<16x80xf32>
    %185 = arith.mulf %184, %139 : vector<16x80xf32>
    %186 = vector.broadcast %156 : vector<1x80xf32> to vector<16x80xf32>
    %187 = arith.mulf %186, %183 : vector<16x80xf32>
    %188 = arith.addf %185, %187 : vector<16x80xf32>
    %189 = vector.extract_strided_slice %140 {offsets = [1, 0], sizes = [1, 80], strides = [1, 1]} : vector<2x80xf32> to vector<1x80xf32>
    %190 = vector.extract_strided_slice %141 {offsets = [1, 0], sizes = [1, 80], strides = [1, 1]} : vector<2x80xf32> to vector<1x80xf32>
    %191 = vector.broadcast %0 : f32 to vector<1x80xf32>
    %192 = arith.mulf %190, %191 : vector<1x80xf32>
    %193 = arith.negf %192 : vector<1x80xf32>
    %194 = math.exp %193 : vector<1x80xf32>
    %cst_62 = arith.constant 1.000000e+00 : f32
    %195 = vector.broadcast %cst_62 : f32 to vector<1x80xf32>
    %196 = arith.addf %195, %194 : vector<1x80xf32>
    %197 = arith.divf %195, %196 : vector<1x80xf32>
    %198 = arith.mulf %197, %197 : vector<1x80xf32>
    %cst_63 = arith.constant 1.000000e+00 : f32
    %199 = vector.broadcast %cst_63 : f32 to vector<1x80xf32>
    %200 = arith.subf %199, %198 : vector<1x80xf32>
    %cst_64 = arith.constant 0.000000e+00 : f32
    %201 = vector.broadcast %cst_64 : f32 to vector<1x80xf32>
    %202 = arith.maximumf %200, %201 : vector<1x80xf32>
    %203 = math.sqrt %202 : vector<1x80xf32>
    %204 = vector.broadcast %0 : f32 to vector<1x80xf32>
    %205 = arith.mulf %189, %204 : vector<1x80xf32>
    %cst_65 = arith.constant 1.000000e+00 : f32
    %206 = vector.broadcast %cst_65 : f32 to vector<1x80xf32>
    %207 = arith.addf %206, %205 : vector<1x80xf32>
    %208 = vector.broadcast %207 : vector<1x80xf32> to vector<16x80xf32>
    %209 = arith.mulf %188, %208 : vector<16x80xf32>
    %210 = arith.truncf %209 : vector<16x80xf32> to vector<16x80xbf16>
    %cst_66 = arith.constant dense<0.000000e+00> : vector<48x80xf32>
    %211 = tpu.matmul %17, %210, %cst_66 {dimension_numbers = #tpu.dot_dimension_numbers<[1], [0], [0], [1], [0, 0, 1, 1], [], []>} : vector<48x16xbf16>, vector<16x80xbf16>, vector<48x80xf32> -> vector<48x80xf32>
    %212 = arith.mulf %108, %211 : vector<48x80xf32>
    %213 = arith.truncf %212 : vector<48x80xf32> to vector<48x80xbf16>
    %cst_67 = arith.constant dense<0.000000e+00> : vector<16x80xf32>
    %214 = tpu.matmul %23, %213, %cst_67 {dimension_numbers = #tpu.dot_dimension_numbers<[1], [0], [0], [1], [0, 0, 1, 1], [], []>} : vector<16x48xbf16>, vector<48x80xbf16>, vector<16x80xf32> -> vector<16x80xf32>
    %215 = arith.truncf %214 : vector<16x80xf32> to vector<16x80xbf16>
    %c208 = arith.constant 208 : index
    %c0_68 = arith.constant 0 : index
    %216 = vector.load %arg3[%c208, %c0_68] : memref<313x80xf32, #tpu.memory_space<vmem>>, vector<80x80xf32>
    %217 = arith.truncf %216 : vector<80x80xf32> to vector<80x80xbf16>
    %cst_69 = arith.constant dense<0.000000e+00> : vector<16x80xf32>
    %218 = tpu.matmul %215, %217, %cst_69 {dimension_numbers = #tpu.dot_dimension_numbers<[1], [0], [0], [1], [0, 0, 1, 1], [], []>} : vector<16x80xbf16>, vector<80x80xbf16>, vector<16x80xf32> -> vector<16x80xf32>
    %219 = arith.negf %218 : vector<16x80xf32>
    %220 = math.exp %219 : vector<16x80xf32>
    %cst_70 = arith.constant 1.000000e+00 : f32
    %221 = vector.broadcast %cst_70 : f32 to vector<16x80xf32>
    %222 = arith.addf %221, %220 : vector<16x80xf32>
    %223 = arith.divf %221, %222 : vector<16x80xf32>
    %cst_71 = arith.constant 1.000000e+00 : f32
    %224 = vector.broadcast %cst_71 : f32 to vector<16x80xf32>
    %225 = arith.subf %223, %224 : vector<16x80xf32>
    %226 = vector.broadcast %118 : vector<1x80xf32> to vector<16x80xf32>
    %227 = arith.mulf %226, %225 : vector<16x80xf32>
    %cst_72 = arith.constant 1.000000e+00 : f32
    %228 = vector.broadcast %cst_72 : f32 to vector<16x80xf32>
    %229 = arith.addf %228, %227 : vector<16x80xf32>
    %230 = arith.mulf %218, %229 : vector<16x80xf32>
    %231 = vector.broadcast %197 : vector<1x80xf32> to vector<16x80xf32>
    %232 = arith.mulf %231, %188 : vector<16x80xf32>
    %233 = vector.broadcast %203 : vector<1x80xf32> to vector<16x80xf32>
    %234 = arith.mulf %233, %230 : vector<16x80xf32>
    %235 = arith.addf %232, %234 : vector<16x80xf32>
    %236 = tpu.iota {dimensions = array<i32: 0>} : vector<80x3xi32>
    %237 = tpu.iota {dimensions = array<i32: 1>} : vector<80x3xi32>
    %c1_i32 = arith.constant 1 : i32
    %238 = vector.broadcast %c1_i32 : i32 to vector<80x3xi32>
    %239 = arith.addi %237, %238 : vector<80x3xi32>
    %c8_i32 = arith.constant 8 : i32
    %240 = vector.broadcast %c8_i32 : i32 to vector<80x3xi32>
    %241 = arith.muli %239, %240 : vector<80x3xi32>
    %242 = arith.cmpi sge, %236, %241 : vector<80x3xi32>
    %c8_i32_73 = arith.constant 8 : i32
    %243 = vector.broadcast %c8_i32_73 : i32 to vector<80x3xi32>
    %244 = arith.addi %241, %243 : vector<80x3xi32>
    %245 = arith.cmpi slt, %236, %244 : vector<80x3xi32>
    %246 = arith.andi %242, %245 : vector<80x3xi1>
    %247 = arith.extui %246 : vector<80x3xi1> to vector<80x3xi32>
    %248 = arith.sitofp %247 : vector<80x3xi32> to vector<80x3xf32>
    %c302 = arith.constant 302 : index
    %c0_74 = arith.constant 0 : index
    %249 = vector.load %arg3[%c302, %c0_74] : memref<313x80xf32, #tpu.memory_space<vmem>>, vector<1x80xf32>
    %250 = vector.broadcast %249 : vector<1x80xf32> to vector<16x80xf32>
    %251 = arith.mulf %235, %250 : vector<16x80xf32>
    %cst_75 = arith.constant dense<0.000000e+00> : vector<16x3xf32>
    %252 = tpu.matmul %251, %248, %cst_75 {dimension_numbers = #tpu.dot_dimension_numbers<[1], [0], [0], [1], [0, 0, 1, 1], [], []>} : vector<16x80xf32>, vector<80x3xf32>, vector<16x3xf32> -> vector<16x3xf32>
    %253 = vector.broadcast %1 : f32 to vector<16x3xf32>
    %254 = arith.mulf %253, %252 : vector<16x3xf32>
    %c0_76 = arith.constant 0 : index
    %c0_77 = arith.constant 0 : index
    %255 = vector.load %arg4[%c0_76, %c0_77] : memref<16x3xf32, #tpu.memory_space<vmem>>, vector<16x3xf32>
    tpu.vector_store %arg4[%c0_76, %c0_77], %254 {strides = array<i32>} : memref<16x3xf32, #tpu.memory_space<vmem>>, vector<16x3xf32>,
    return
  }
}

</mosaic_0001>

<bundles_post_ra>
// kernel: e3conv_forward.1
= control target key start
LH: loop header
LB: loop body
LE: loop exit
PB: predicated region body
PF: predicated region fallthrough
CT: control target
= control target key end

     0   :  { %9 = vsyncpa [#allocation3], 0  ;;  %s3001_s0 = inlined_call_operand.vmem [shape: f32[1,2], index: 0, kind: input, shape index: {}]   ;;  %s3002_s1 = inlined_call_operand.vmem [shape: f32[16,3], index: 1, kind: input, shape index: {}]   ;;  %s3003_s2 = inlined_call_operand.vmem [shape: s32[49,48], index: 2, kind: input, shape index: {}]   ;;  %s3004_s3 = inlined_call_operand.vmem [shape: f32[313,80], index: 3, kind: input, shape index: {}]   ;;  %s3005_s4 = inlined_call_operand.vmem [shape: f32[16,3], index: 4, kind: output, shape index: {}]  }
   0x1   :  { %s16_s17 = sshll.u32 %s3001_s0, 4  ;;  %s17_s17 = int_to_ptr.vmem [resolvable:$true] %s16_s17 }
   0x2   :  { %s2343_s18 = scalar_lea.vmem %s17_s17, 16  ;;  %p2348_p1 = scmp.lt.s32.totalorder %s17_s17, %s17_s17 }
   0x3   :  { %p2344_p0 = scmp.ne.s32.totalorder %s17_s17, %s2343_s18  ;;  %p2349_p2 = scmp.lt.s32.totalorder %s2343_s18, %s2343_s18 }
   0x5   :  { %p2350_p3 = por %p2349_p2, %p2348_p1 }
   0x7   :  { %p2351_p4 = pnand %p2350_p3, %p2344_p0 }
   0x9   :  { %2354 = shalt.err (!%p2351_p4)
}
   0xa   :  { %s2357_s19 = smov [#allocation2]  }
   0xb   :  { %19 = dma.vmem_to_smem %s17_s17, 16, %s2357_s19, [#allocation3]  }
   0xc   :  { %2355 = dma.done.wait [#allocation3], 16  }
   0xd   :  { %2356 = vsyncadd [#allocation3], 4294967280 }
   0xe   :  { %29 = sfence }
   0xf   :  { %v2398_v0 = vld [vmem:[%s3003_s2 + $0x8] sm:$0xff]  ;;  %v2403_v1 = vld [vmem:[%s3003_s2] sm:$0xff]  ;;  %v2358_v2 = vmov 0   ;;  %v2359_v5 = vmov 1   ;;  %v2418_v6 = vld [vmem:[%s3003_s2 + $0x10] sm:$0xff]  ;;  %v2360_v7 = vmov 0.0   ;;  %v46_v11 = vlaneseq }
  0x10   :  { %2259 = vset.pattern.permute.xlu1 %v2358_v2  ;;  %2257 = vset.pattern.permute.xlu0 %v2358_v2  ;;  %v156_v3 = vld [vmem:[%s3002_s1 + $0x8] sm:$0xff]  ;;  %v155_v4 = vld [vmem:[%s3002_s1] sm:$0xff]  ;;  %v2426_v8 = vld [vmem:[%s3003_s2 + $0x18] sm:$0xff]  ;;  %vm157_vm4 = vcmask 130048   ;;  %vm277_vm13 = vcmask 23552   ;;  %vm347_vm14 = vcmask 1042432  }
  0x11   :  { %52 = vperm.xlu1 %2259, %v2398_v0   ;;  %49 = vperm.xlu0 %2257, %v2403_v1   ;;  %v2433_v9 = vld [vmem:[%s3003_s2 + $0x20] sm:$0xff]  ;;  %v2440_v10 = vld [vmem:[%s3003_s2 + $0x28] sm:$0xff]  ;;  %v2445_v12 = vand.u32 127, %v46_v11  ;;  %vm2361_vm15 = vmmov 0   ;;  %s2364_s23 = smov 112   ;;  %s2365_s29 = smov 96  }
  0x12   :  { %2025 = vmatprep.subr.mxu0 %v156_v3  ;;  %s31_s30 = sld [smem:[#allocation2]] }
  0x13   :  { %2026 = vmatpush3.msra.mxu0 %v156_v3 }
  0x14   :  { %2027 = vmatprep.subr.mxu0 %v155_v4 }
  0x15   :  { %2260 = vset.pattern.permute.xlu1 %v2359_v5  ;;  %2258 = vset.pattern.permute.xlu0 %v2359_v5  ;;  %v2362_v5 = vmov 2  }
  0x16   :  { %88 = vperm.xlu1 %2260, %v2398_v0   ;;  %85 = vperm.xlu0 %2258, %v2403_v1  }
  0x17   :  { %2028 = vmatpush3.msra.mxu0 %v155_v4  ;;  %v40_v4 = vcvt.s32.f32 %v2398_v0 }
  0x18   :  { %2063 = vmatprep.subr.bf16.mxu0 %v2360_v7 }
  0x1a   :  { %2261 = vset.pattern.permute.xlu1 %v2358_v2  ;;  %91 = vperm.xlu0 %2258, %v2418_v6   ;;  %v2516_v2 = vld [vmem:[%s3004_s3 + $0x12f] sm:$0xf] }
  0x1b   :  { %55 = vperm.xlu1 %2261, %v2418_v6   ;;  %v328_v3 = vrot.slane %v2516_v2, 1 }
  0x1d   :  { %2038 = vmatprep.subr.msk.mxu1 %vm347_vm14, %v328_v3 }
  0x1e   :  { %94 = vperm.xlu0 %2258, %v2426_v8   ;;  %2039 = vmatpush3.msk.msra.mxu1 %vm347_vm14, %v328_v3 }
  0x1f   :  { %58 = vperm.xlu1 %2261, %v2426_v8   ;;  %2049 = vmatprep.subr.bf16.mxu1 %v2360_v7 }
  0x22   :  { %97 = vperm.xlu0 %2258, %v2433_v9  }
  0x23   :  { %61 = vperm.xlu1 %2261, %v2433_v9  }
  0x26   :  { %100 = vperm.xlu0 %2258, %v2440_v10  }
  0x27   :  { %64 = vperm.xlu1 %2261, %v2440_v10  }
  0x2a   :  { %2262 = vset.pattern.permute.xlu0 %v2362_v5 }
  0x2b   :  { %2263 = vset.pattern.permute.xlu1 %v2362_v5 }
  0x8c   :  { %v53_v13 = vpop.permute.xlu1 %52  ;;  %v50_v14 = vpop.permute.xlu0 %49 }
  0x8d   :  { %vm67_vm0 = vcmp.eq.s32.totalorder %v2445_v12, %v53_v13  ;;  %vm66_vm1 = vcmp.eq.s32.totalorder %v2445_v12, %v50_v14  ;;  %v39_v13 = vcvt.s32.f32 %v2403_v1  ;;  %v41_v14 = vcvt.s32.f32 %v2418_v6 }
  0x8e   :  { %v1830_v15 = vsel %vm67_vm0, 1.0, %v2360_v7  ;;  %v1829_v16 = vsel %vm66_vm1, 1.0, %v2360_v7  ;;  %vm520_vm0 = vcmask 1041408   ;;  %vm510_vm1 = vcmask 31744  }
  0x8f   :  { %v2451_v17 = vpack.c.bf16 %v1830_v15, %v1829_v16 }
  0x91   :  { %v89_v18 = vpop.permute.xlu1 %88  ;;  %v86_v19 = vpop.permute.xlu0 %85 }
  0x92   :  { %vm103_vm2 = vcmp.eq.s32.totalorder %v2445_v12, %v89_v18  ;;  %vm102_vm3 = vcmp.eq.s32.totalorder %v2445_v12, %v86_v19  ;;  %v44_v18 = vcvt.s32.f32 %v2440_v10  ;;  %v503_v10 = vld [vmem:[%s3004_s3 + $0x133] sm:$0xf] }
  0x93   :  { %v1836_v20 = vsel %vm103_vm2, 1.0, %v2360_v7  ;;  %v1835_v21 = vsel %vm102_vm3, 1.0, %v2360_v7  ;;  %vm936_vm2 = vcmask 1044480   ;;  %vm929_vm3 = vcmask 39936  }
  0x94   :  { %v150_v22 = vsub.f32 %v1830_v15, %v1836_v20  ;;  %v149_v23 = vsub.f32 %v1829_v16, %v1835_v21  ;;  %v42_v15 = vcvt.s32.f32 %v2426_v8  ;;  %v43_v16 = vcvt.s32.f32 %v2433_v9 }
  0x95   :  { %v92_v24 = vpop.permute.xlu0 %91 }
  0x96   :  { %vm104_vm5 = vcmp.eq.s32.totalorder %v2445_v12, %v92_v24  ;;  %v56_v25 = vpop.permute.xlu1 %55  ;;  %2029 = vmatprep.mubr.msk.f32.mxu0 %vm157_vm4, %v149_v23  ;;  %v455_v23 = vcvt.s32.f32 %v2445_v12 }
  0x97   :  { %v1837_v26 = vsel %vm104_vm5, 1.0, %v2360_v7  ;;  %vm68_vm6 = vcmp.eq.s32.totalorder %v2445_v12, %v56_v25  ;;  %2030 = vmatmul.mubr.msk.f32.vlgmr.msra.gmra.mxu0 %vm157_vm4, %v150_v22 }
  0x98   :  { %v1831_v27 = vsel %vm68_vm6, 1.0, %v2360_v7 }
  0x99   :  { %v151_v28 = vsub.f32 %v1831_v27, %v1837_v26  ;;  %v95_v29 = vpop.permute.xlu0 %94  ;;  %v456_v26 = vadd.f32 1.0, %v455_v23 }
  0x9a   :  { %vm105_vm7 = vcmp.eq.s32.totalorder %v2445_v12, %v95_v29  ;;  %v59_v30 = vpop.permute.xlu1 %58 }
  0x9b   :  { %v1838_v31 = vsel %vm105_vm7, 1.0, %v2360_v7  ;;  %vm69_vm8 = vcmp.eq.s32.totalorder %v2445_v12, %v59_v30  ;;  %2032 = vmatprep.mubr.msk.f32.mxu0 %vm157_vm4, %v151_v28  ;;  %v2529_v9 = vmul.f32 0.8, %v456_v26 }
  0x9c   :  { %v1832_v32 = vsel %vm69_vm8, 1.0, %v2360_v7 }
  0x9d   :  { %v2468_v33 = vpack.c.bf16 %v1832_v32, %v1831_v27  ;;  %v152_v34 = vsub.f32 %v1832_v32, %v1838_v31  ;;  %v98_v35 = vpop.permute.xlu0 %97 }
  0x9e   :  { %vm106_vm9 = vcmp.eq.s32.totalorder %v2445_v12, %v98_v35  ;;  %v62_v36 = vpop.permute.xlu1 %61  ;;  %v504_v35 = vpack.c.bf16 %v503_v10, %v503_v10 }
  0x9f   :  { %v1839_v37 = vsel %vm106_vm9, 1.0, %v2360_v7  ;;  %vm70_vm10 = vcmp.eq.s32.totalorder %v2445_v12, %v62_v36  ;;  %2033 = vmatmul.mubr.msk.f32.gmra.mxu0 %vm157_vm4, %v152_v34  ;;  %vm1102_vm9 = vcmask 392192  }
  0xa0   :  { %v1833_v38 = vsel %vm70_vm10, 1.0, %v2360_v7  ;;  %vm1163_vm10 = vcmask 654336  }
  0xa1   :  { %v153_v39 = vsub.f32 %v1833_v38, %v1839_v37  ;;  %v101_v40 = vpop.permute.xlu0 %100 }
  0xa2   :  { %vm107_vm11 = vcmp.eq.s32.totalorder %v2445_v12, %v101_v40  ;;  %v65_v41 = vpop.permute.xlu1 %64 }
  0xa3   :  { %v1840_v42 = vsel %vm107_vm11, 1.0, %v2360_v7  ;;  %vm71_vm12 = vcmp.eq.s32.totalorder %v2445_v12, %v65_v41  ;;  %2035 = vmatprep.mubr.msk.f32.mxu0 %vm157_vm4, %v153_v39 }
  0xa4   :  { %v1834_v43 = vsel %vm71_vm12, 1.0, %v2360_v7 }
  0xa5   :  { %v2480_v44 = vpack.c.bf16 %v1834_v43, %v1833_v38  ;;  %v154_v45 = vsub.f32 %v1834_v43, %v1840_v42 }
  0xa7   :  { %2036 = vmatmul.mubr.msk.f32.gmra.mxu0 %vm157_vm4, %v154_v45 }
  0xa8   :  { %2065 = vmatprep.mubr.msk.bf16.mxu0 %vm2361_vm15, %v2360_v7 }
 0x157   :  { %v2483_v46 = vpop.f32.mrf.mxu0 }
 0x158   :  { %v272_v47 = vmul.f32 %v2483_v46, %v2483_v46 }
 0x159   :  { %v2487_v48 = vpop.f32.mrf.mxu0 }
 0x15a   :  { %v271_v49 = vmul.f32 %v2487_v48, %v2487_v48  ;;  %v281_v50 = vsel %vm277_vm13, %v272_v47, 0.0 }
 0x15b   :  { %282 = vadd.xlane.f32.xlu0 %v281_v50 }
 0x15c   :  { %v278_v51 = vsel %vm277_vm13, %v271_v49, 0.0  ;;  %v522_v49 = vsel %vm520_vm0, %v504_v35, 0 }
 0x15d   :  { %279 = vadd.xlane.f32.xlu1 %v278_v51 }
 0x15f   :  { %v2493_v52 = vpop.f32.mrf.mxu0 }
 0x160   :  { %v274_v53 = vmul.f32 %v2493_v52, %v2493_v52 }
 0x161   :  { %v2497_v54 = vpop.f32.mrf.mxu0 }
 0x162   :  { %v273_v55 = vmul.f32 %v2497_v54, %v2497_v54  ;;  %v287_v56 = vsel %vm277_vm13, %v274_v53, 0.0 }
 0x163   :  { %288 = vadd.xlane.f32.xlu1 %v287_v56 }
 0x164   :  { %v284_v57 = vsel %vm277_vm13, %v273_v55, 0.0 }
 0x165   :  { %285 = vadd.xlane.f32.xlu0 %v284_v57 }
 0x167   :  { %v2503_v58 = vpop.f32.mrf.mxu0 }
 0x168   :  { %v276_v59 = vmul.f32 %v2503_v58, %v2503_v58 }
 0x169   :  { %v2507_v60 = vpop.f32.mrf.mxu0 }
 0x16a   :  { %v275_v61 = vmul.f32 %v2507_v60, %v2507_v60  ;;  %v293_v62 = vsel %vm277_vm13, %v276_v59, 0.0 }
 0x16b   :  { %294 = vadd.xlane.f32.xlu1 %v293_v62 }
 0x16c   :  { %v290_v63 = vsel %vm277_vm13, %v275_v61, 0.0 }
 0x16d   :  { %291 = vadd.xlane.f32.xlu0 %v290_v63 }
 0x17c   :  { %589 = vperm.xlu1 %2263, %v40_v4  }
 0x180   :  { %594 = vperm.xlu1 %2263, %v41_v14  }
 0x183   :  { %584 = vperm.xlu0 %2262, %v39_v13  }
 0x184   :  { %599 = vperm.xlu1 %2263, %v42_v15  }
 0x188   :  { %604 = vperm.xlu1 %2263, %v43_v16  }
 0x18c   :  { %609 = vperm.xlu1 %2263, %v44_v18  }
 0x1e4   :  { %v283_v19 = vpop.xlane.xlu0 %282 }
 0x1e5   :  { %v297_v20 = vmax.f32 %v283_v19, 1e-12 }
 0x1e6   :  { %v280_v21 = vpop.xlane.xlu1 %279 }
 0x1e7   :  { %2265 = vrsqrt.f32 %v297_v20  ;;  %v296_v22 = vmax.f32 %v280_v21, 1e-12 }
 0x1e9   :  { %2267 = vrsqrt.f32 %v296_v22 }
 0x1ec   :  { %v289_v6 = vpop.xlane.xlu1 %288 }
 0x1ed   :  { %v299_v24 = vmax.f32 %v289_v6, 1e-12 }
 0x1ee   :  { %v286_v25 = vpop.xlane.xlu0 %285 }
 0x1ef   :  { %2269 = vrsqrt.f32 %v299_v24  ;;  %v298_v8 = vmax.f32 %v286_v25, 1e-12 }
 0x1f1   :  { %2271 = vrsqrt.f32 %v298_v8 }
 0x1f4   :  { %v2266_v27 = vpop.eup %2265  ;;  %v295_v28 = vpop.xlane.xlu1 %294 }
 0x1f5   :  { %v309_v29 = vmul.f32 %v2266_v27, %v283_v19  ;;  %v301_v30 = vmax.f32 %v295_v28, 1e-12  ;;  %v315_v34 = vmul.f32 1.7320508, %v2266_v27 }
 0x1f6   :  { %v2268_v31 = vpop.eup %2267  ;;  %v292_v32 = vpop.xlane.xlu0 %291 }
 0x1f7   :  { %v459_v36 = vsub.f32 %v309_v29, %v2529_v9  ;;  %v308_v37 = vmul.f32 %v2268_v31, %v280_v21  ;;  %2273 = vrsqrt.f32 %v301_v30  ;;  %v300_v38 = vmax.f32 %v292_v32, 1e-12 }
 0x1f8   :  { %v314_v39 = vmul.f32 1.7320508, %v2268_v31  ;;  %v321_v47 = vmul.f32 %v2483_v46, %v315_v34 }
 0x1f9   :  { %v465_v40 = vmul.f32 1.25, %v459_v36  ;;  %v458_v41 = vsub.f32 %v308_v37, %v2529_v9  ;;  %2275 = vrsqrt.f32 %v300_v38 }
 0x1fa   :  { %v320_v42 = vmul.f32 %v314_v39, %v2487_v48 }
 0x1fb   :  { %v471_v43 = vmul.f32 %v465_v40, %v465_v40  ;;  %v464_v45 = vmul.f32 1.25, %v458_v41 }
 0x1fc   :  { %v2270_v50 = vpop.eup %2269  ;;  %2040 = vmatprep.mubr.msk.f32.mxu1 %vm277_vm13, %v320_v42 }
 0x1fd   :  { %v477_v51 = vsub.f32 0.0, %v471_v43  ;;  %v470_v53 = vmul.f32 %v464_v45, %v464_v45  ;;  %v311_v55 = vmul.f32 %v2270_v50, %v289_v6  ;;  %2041 = vmatmul.mubr.msk.f32.vlgmr.msra.gmra.mxu1 %vm277_vm13, %v321_v47  ;;  %v317_v57 = vmul.f32 1.7320508, %v2270_v50 }
 0x1fe   :  { %v2272_v56 = vpop.eup %2271  ;;  %2050 = vmatpush3.bf16.msra.mxu1 %v522_v49 }
 0x1ff   :  { %v484_v59 = vmul.f32 1.442695, %v477_v51  ;;  %v476_v61 = vsub.f32 0.0, %v470_v53  ;;  %v461_v48 = vsub.f32 %v311_v55, %v2529_v9  ;;  %v310_v62 = vmul.f32 %v2272_v56, %v286_v25  ;;  %2077 = vmatprep.subr.bf16.mxu1 %v2360_v7  ;;  %v673_v51 = vld [vmem:[%s3004_s3] sm:$0xff]  ;;  %v674_v53 = vld [vmem:[%s3004_s3 + $0x8] sm:$0xff] }
 0x200   :  { %v316_v46 = vmul.f32 1.7320508, %v2272_v56  ;;  %v323_v15 = vmul.f32 %v2493_v52, %v317_v57  ;;  %v675_v55 = vpack.c.bf16 %v674_v53, %v673_v51  ;;  %v2363_v56 = vmov 3   ;;  %v753_v57 = vld [vmem:[%s3004_s3 + $0x10] sm:$0xff] }
 0x201   :  { %2277 = vpow2.f32 %v484_v59  ;;  %v482_v63 = vmul.f32 1.442695, %v476_v61  ;;  %v467_v3 = vmul.f32 1.25, %v461_v48  ;;  %v460_v4 = vsub.f32 %v310_v62, %v2529_v9  ;;  %2264 = vset.pattern.permute.xlu1 %v2363_v56  ;;  %v754_v59 = vld [vmem:[%s3004_s3 + $0x18] sm:$0xff] }
 0x202   :  { %v322_v5 = vmul.f32 %v316_v46, %v2497_v54  ;;  %2064 = vmatpush3.bf16.msra.mxu0 %v675_v55  ;;  %v755_v61 = vpack.c.bf16 %v754_v59, %v753_v57  ;;  %v2578_v48 = vshrl.u32 %v46_v11, 7 }
 0x203   :  { %2279 = vpow2.f32 %v482_v63  ;;  %v473_v13 = vmul.f32 %v467_v3, %v467_v3  ;;  %v466_v14 = vmul.f32 1.25, %v460_v4  ;;  %2091 = vmatprep.subr.bf16.mxu0 %v2360_v7 }
 0x204   :  { %v2274_v16 = vpop.eup %2273  ;;  %2043 = vmatprep.mubr.msk.f32.mxu1 %vm277_vm13, %v322_v5  ;;  %v2581_v62 = vsub.s32 0, %v2578_v48 }
 0x205   :  { %v479_v18 = vsub.f32 0.0, %v473_v13  ;;  %v472_v19 = vmul.f32 %v466_v14, %v466_v14  ;;  %v313_v20 = vmul.f32 %v2274_v16, %v295_v28  ;;  %2044 = vmatmul.mubr.msk.f32.gmra.mxu1 %vm277_vm13, %v323_v15  ;;  %v319_v22 = vmul.f32 1.7320508, %v2274_v16 }
 0x206   :  { %v2276_v21 = vpop.eup %2275  ;;  %v448_v46 = vrot.slane %v2516_v2, %v2581_v62  ;;  %v1863_v2 = vld [vmem:[%s3004_s3 + $0x138] ss:$0 sm:$0xff] }
 0x207   :  { %v488_v23 = vmul.f32 1.442695, %v479_v18  ;;  %v478_v6 = vsub.f32 0.0, %v472_v19  ;;  %v463_v24 = vsub.f32 %v313_v20, %v2529_v9  ;;  %v312_v54 = vmul.f32 %v2276_v21, %v292_v32  ;;  %v590_v19 = vpop.permute.xlu1 %589 }
 0x208   :  { %v318_v25 = vmul.f32 1.7320508, %v2276_v21  ;;  %v325_v29 = vmul.f32 %v2503_v58, %v319_v22  ;;  %v585_v22 = vpop.permute.xlu0 %584 }
 0x209   :  { %2281 = vpow2.f32 %v488_v23  ;;  %v486_v26 = vmul.f32 1.442695, %v478_v6  ;;  %v469_v8 = vmul.f32 1.25, %v463_v24  ;;  %v462_v52 = vsub.f32 %v312_v54, %v2529_v9  ;;  %v1859_v23 = vld [vmem:[%s3004_s3 + $0x137] ss:$0 sm:$0xff] }
 0x20a   :  { %v324_v10 = vmul.f32 %v318_v25, %v2507_v60  ;;  %v616_v6 = vmul.f32 %v1863_v2, %v585_v22 }
 0x20b   :  { %2283 = vpow2.f32 %v486_v26  ;;  %v475_v27 = vmul.f32 %v469_v8, %v469_v8  ;;  %v468_v28 = vmul.f32 1.25, %v462_v52  ;;  %v595_v24 = vpop.permute.xlu1 %594  ;;  %v617_v8 = vmul.f32 %v1863_v2, %v590_v19 }
 0x20c   :  { %2046 = vmatprep.mubr.msk.f32.mxu1 %vm277_vm13, %v324_v10 }
 0x20d   :  { %v481_v30 = vsub.f32 0.0, %v475_v27  ;;  %v474_v31 = vmul.f32 %v468_v28, %v468_v28  ;;  %2047 = vmatmul.mubr.msk.f32.gmra.mxu1 %vm277_vm13, %v325_v29 }
 0x20e   :  { %v2278_v32 = vpop.eup %2277  ;;  %2051 = vmatprep.mubr.msk.bf16.mxu1 %vm2361_vm15, %v2360_v7 }
 0x20f   :  { %v492_v34 = vmul.f32 1.442695, %v481_v30  ;;  %v480_v35 = vsub.f32 0.0, %v474_v31  ;;  %v495_v36 = vmul.f32 0.89285713, %v2278_v32  ;;  %v600_v29 = vpop.permute.xlu1 %599 }
 0x210   :  { %v2280_v9 = vpop.eup %2279 }
 0x211   :  { %v494_v60 = vmul.f32 0.89285713, %v2280_v9  ;;  %2285 = vpow2.f32 %v492_v34  ;;  %v490_v37 = vmul.f32 1.442695, %v480_v35  ;;  %v618_v34 = vmul.f32 %v1863_v2, %v595_v24 }
 0x213   :  { %v500_v38 = vpack.c.bf16 %v495_v36, %v494_v60  ;;  %2287 = vpow2.f32 %v490_v37  ;;  %v605_v37 = vpop.permute.xlu1 %604 }
 0x215   :  { %2052 = vmatmul.mubr.msk.bf16.vlgmr.msra.gmra.mxu1 %vm510_vm1, %v500_v38 }
 0x216   :  { %v2282_v58 = vpop.eup %2281  ;;  %2055 = vmatprep.mubr.msk.bf16.mxu1 %vm2361_vm15, %v2360_v7  ;;  %2078 = vmatpush3.bf16.msra.mxu1 %v755_v61 }
 0x217   :  { %v497_v41 = vmul.f32 0.89285713, %v2282_v58  ;;  %v619_v58 = vmul.f32 %v1863_v2, %v600_v29  ;;  %v842_v29 = vld [vmem:[%s3004_s3 + $0x20] sm:$0xff] }
 0x218   :  { %v2284_v39 = vpop.eup %2283 }
 0x219   :  { %v496_v40 = vmul.f32 0.89285713, %v2284_v39 }
 0x21b   :  { %v501_v42 = vpack.c.bf16 %v497_v41, %v496_v40 }
 0x21d   :  { %2056 = vmatmul.mubr.msk.bf16.gmra.mxu1 %vm510_vm1, %v501_v42 }
 0x21e   :  { %v2286_v43 = vpop.eup %2285  ;;  %2059 = vmatprep.mubr.msk.bf16.mxu1 %vm2361_vm15, %v2360_v7 }
 0x21f   :  { %v499_v49 = vmul.f32 0.89285713, %v2286_v43 }
 0x220   :  { %v2288_v45 = vpop.eup %2287 }
 0x221   :  { %v498_v47 = vmul.f32 0.89285713, %v2288_v45  ;;  %v620_v45 = vmul.f32 %v1863_v2, %v605_v37 }
 0x223   :  { %v502_v50 = vpack.c.bf16 %v499_v49, %v498_v47 }
 0x225   :  { %2060 = vmatmul.mubr.msk.bf16.gmra.mxu1 %vm510_vm1, %v502_v50  ;;  %v610_v50 = vpop.permute.xlu1 %609 }
 0x226   :  { %2079 = vmatprep.mubr.msk.bf16.mxu1 %vm2361_vm15, %v2360_v7  ;;  %v621_v59 = vmul.f32 %v1863_v2, %v610_v50 }
 0x2bd   :  { %v2042_v63 = vpop.f32.mrf.mxu1 }
 0x2be   :  { %v2585_v3 = vadd.f32 %v2042_v63, %v448_v46 }
 0x2bf   :  { %v416_v4 = vpop.f32.mrf.mxu1 }
 0x2c0   :  { %v2587_v5 = vadd.f32 %v448_v46, %v416_v4 }
 0x2c5   :  { %v2045_v13 = vpop.f32.mrf.mxu1 }
 0x2c6   :  { %v2589_v14 = vadd.f32 %v2045_v13, %v448_v46 }
 0x2c7   :  { %v426_v15 = vpop.f32.mrf.mxu1 }
 0x2c8   :  { %v2591_v16 = vadd.f32 %v448_v46, %v426_v15 }
 0x2cd   :  { %v2048_v11 = vpop.f32.mrf.mxu1 }
 0x2ce   :  { %v2593_v18 = vadd.f32 %v2048_v11, %v448_v46 }
 0x2cf   :  { %v436_v20 = vpop.f32.mrf.mxu1 }
 0x2d0   :  { %v2595_v21 = vadd.f32 %v448_v46, %v436_v20 }
 0x2d5   :  { %v558_v54 = vpop.f32.mrf.mxu1 }
 0x2d6   :  { %v559_v25 = vadd.f32 %v1859_v23, %v558_v54 }
 0x2d7   :  { %v2053_v26 = vpop.f32.mrf.mxu1 }
 0x2d8   :  { %v622_v52 = vadd.f32 %v616_v6, %v559_v25 }
 0x2d9   :  { %v561_v10 = vpop.f32.mrf.mxu1 }
 0x2da   :  { %v1864_v27 = vmul.f32 -1.442695, %v622_v52  ;;  %v562_v28 = vadd.f32 %v1859_v23, %v561_v10 }
 0x2db   :  { %v2054_v30 = vpop.f32.mrf.mxu1 }
 0x2dc   :  { %2289 = vpow2.f32 %v1864_v27  ;;  %v623_v31 = vadd.f32 %v617_v8, %v562_v28 }
 0x2dd   :  { %v566_v32 = vpop.f32.mrf.mxu1 }
 0x2de   :  { %v1865_v35 = vmul.f32 -1.442695, %v623_v31  ;;  %v567_v9 = vadd.f32 %v1859_v23, %v566_v32 }
 0x2df   :  { %v2057_v36 = vpop.f32.mrf.mxu1 }
 0x2e0   :  { %2291 = vpow2.f32 %v1865_v35  ;;  %v624_v60 = vadd.f32 %v618_v34, %v567_v9  ;;  %v928_v9 = vld [vmem:[%s3004_s3 + $0x120] sm:$0x1f] }
 0x2e1   :  { %v569_v38 = vpop.f32.mrf.mxu1  ;;  %2105 = vmatprep.subr.msk.mxu1 %vm936_vm2, %v928_v9 }
 0x2e2   :  { %v1866_v39 = vmul.f32 -1.442695, %v624_v60  ;;  %v570_v40 = vadd.f32 %v1859_v23, %v569_v38 }
 0x2e3   :  { %v2058_v41 = vpop.f32.mrf.mxu1 }
 0x2e4   :  { %2293 = vpow2.f32 %v1866_v39  ;;  %v625_v42 = vadd.f32 %v619_v58, %v570_v40 }
 0x2e5   :  { %v574_v43 = vpop.f32.mrf.mxu1 }
 0x2e6   :  { %v1867_v47 = vmul.f32 -1.442695, %v625_v42  ;;  %v575_v49 = vadd.f32 %v1859_v23, %v574_v43 }
 0x2e7   :  { %v2061_v51 = vpop.f32.mrf.mxu1 }
 0x2e8   :  { %2295 = vpow2.f32 %v1867_v47  ;;  %v626_v53 = vadd.f32 %v620_v45, %v575_v49 }
 0x2e9   :  { %v2290_v55 = vpop.eup %2289  ;;  %v577_v56 = vpop.f32.mrf.mxu1 }
 0x2ea   :  { %v646_v57 = vadd.f32 1.0, %v2290_v55  ;;  %v1868_v61 = vmul.f32 -1.442695, %v626_v53  ;;  %v578_v46 = vadd.f32 %v1859_v23, %v577_v56 }
 0x2eb   :  { %v2062_v63 = vpop.f32.mrf.mxu1 }
 0x2ec   :  { %v627_v4 = vadd.f32 %v621_v59, %v578_v46  ;;  %2297 = vpow2.f32 %v1868_v61 }
 0x2ed   :  { %v2292_v13 = vpop.eup %2291  ;;  %2299 = vrcp.f32 %v646_v57 }
 0x2ee   :  { %v647_v15 = vadd.f32 1.0, %v2292_v13  ;;  %v1869_v11 = vmul.f32 -1.442695, %v627_v4 }
 0x2f0   :  { %2301 = vrcp.f32 %v647_v15 }
 0x2f1   :  { %v2294_v19 = vpop.eup %2293  ;;  %2303 = vpow2.f32 %v1869_v11 }
 0x2f2   :  { %v648_v20 = vadd.f32 1.0, %v2294_v19 }
 0x2f4   :  { %2305 = vrcp.f32 %v648_v20 }
 0x2f5   :  { %v2296_v22 = vpop.eup %2295 }
 0x2f6   :  { %v649_v6 = vadd.f32 1.0, %v2296_v22 }
 0x2f8   :  { %2307 = vrcp.f32 %v649_v6 }
 0x2f9   :  { %v2298_v24 = vpop.eup %2297 }
 0x2fa   :  { %v2300_v54 = vpop.eup %2299  ;;  %v650_v2 = vadd.f32 1.0, %v2298_v24 }
 0x2fb   :  { %v664_v26 = vmul.f32 %v2300_v54, %v622_v52  ;;  %v843_v52 = vld [vmem:[%s3004_s3 + $0x28] sm:$0xff] }
 0x2fc   :  { %2309 = vrcp.f32 %v650_v2  ;;  %v1015_v2 = vld [vmem:[%s3004_s3 + $0x129] sm:$0x1] }
 0x2fd   :  { %v2302_v25 = vpop.eup %2301 }
 0x2fe   :  { %v2304_v23 = vpop.eup %2303  ;;  %v665_v8 = vmul.f32 %v2302_v25, %v623_v31  ;;  %v844_v31 = vpack.c.bf16 %v843_v52, %v842_v29  ;;  %v2672_v25 = vstv %s31_s30 }
 0x2ff   :  { %v651_v10 = vadd.f32 1.0, %v2304_v23 }
 0x300   :  { %v670_v27 = vpack.c.bf16 %v665_v8, %v664_v26  ;;  %v1017_v26 = vmul.f32 %v2672_v25, %v1015_v2 }
 0x301   :  { %2311 = vrcp.f32 %v651_v10  ;;  %v2306_v28 = vpop.eup %2305 }
 0x302   :  { %764 = vrot.lane.b32.xlu1 %v670_v27, %s2364_s23  ;;  %2066 = vmatmul.mubr.msk.bf16.vlgmr.msra.gmra.mxu0 %vm157_vm4, %v670_v27  ;;  %v666_v32 = vmul.f32 %v2306_v28, %v624_v60  ;;  %v1018_v28 = vadd.f32 1.0, %v1017_v26 }
 0x303   :  { %2069 = vmatprep.mubr.msk.bf16.mxu0 %vm2361_vm15, %v2360_v7  ;;  %2092 = vmatpush3.bf16.msra.mxu0 %v844_v31 }
 0x304   :  { %2110 = vmatprep.subr.bf16.mxu0 %v2360_v7  ;;  %v1022_v31 = vrot.slane %v1018_v28, %v2581_v62 }
 0x305   :  { %v2308_v30 = vpop.eup %2307 }
 0x306   :  { %v667_v34 = vmul.f32 %v2308_v30, %v625_v42 }
 0x308   :  { %v671_v35 = vpack.c.bf16 %v667_v34, %v666_v32 }
 0x309   :  { %v2310_v36 = vpop.eup %2309 }
 0x30a   :  { %766 = vrot.lane.b32.xlu1 %v671_v35, %s2364_s23  ;;  %2070 = vmatmul.mubr.msk.bf16.gmra.mxu0 %vm157_vm4, %v671_v35  ;;  %v668_v37 = vmul.f32 %v2310_v36, %v626_v53 }
 0x30b   :  { %2073 = vmatprep.mubr.msk.bf16.mxu0 %vm2361_vm15, %v2360_v7 }
 0x30e   :  { %v2312_v60 = vpop.eup %2311  ;;  %138 = vperm.xlu1 %2264, %v2403_v1  }
 0x30f   :  { %v669_v38 = vmul.f32 %v2312_v60, %v627_v4 }
 0x311   :  { %v672_v58 = vpack.c.bf16 %v669_v38, %v668_v37 }
 0x312   :  { %141 = vperm.xlu1 %2264, %v2398_v0  }
 0x313   :  { %768 = vrot.lane.b32.xlu0 %v672_v58, %s2364_s23  ;;  %2074 = vmatmul.mubr.msk.bf16.gmra.mxu0 %vm157_vm4, %v672_v58  ;;  %s1828_s23 = sld [smem:[#allocation2 + $0x1]] }
 0x314   :  { %2093 = vmatprep.mubr.msk.bf16.mxu0 %vm2361_vm15, %v2360_v7 }
 0x316   :  { %852 = vrot.lane.b32.xlu1 %v671_v35, %s2365_s29 }
 0x317   :  { %850 = vrot.lane.b32.xlu0 %v670_v27, %s2365_s29 }
 0x31b   :  { %854 = vrot.lane.b32.xlu0 %v672_v58, %s2365_s29 }
 0x374   :  { %v765_v39 = vpop.permute.xlu1 %764 }
 0x375   :  { %2080 = vmatmul.mubr.msk.bf16.vlgmr.msra.gmra.mxu1 %vm157_vm4, %v765_v39 }
 0x376   :  { %2083 = vmatprep.mubr.msk.bf16.mxu1 %vm2361_vm15, %v2360_v7  ;;  %2106 = vmatpush3.msk.msra.mxu1 %vm936_vm2, %v928_v9 }
 0x377   :  { %2124 = vmatprep.subr.bf16.mxu1 %v2360_v7 }
 0x37c   :  { %v767_v0 = vpop.permute.xlu1 %766 }
 0x37d   :  { %2084 = vmatmul.mubr.msk.bf16.gmra.mxu1 %vm157_vm4, %v767_v0 }
 0x37e   :  { %2087 = vmatprep.mubr.msk.bf16.mxu1 %vm2361_vm15, %v2360_v7 }
 0x385   :  { %v769_v1 = vpop.permute.xlu0 %768 }
 0x386   :  { %2088 = vmatmul.mubr.msk.bf16.gmra.mxu1 %vm157_vm4, %v769_v1 }
 0x389   :  { %v851_v40 = vpop.permute.xlu0 %850  ;;  %v139_v41 = vpop.permute.xlu1 %138 }
 0x38a   :  { %vm143_vm5 = vcmp.eq.s32.totalorder %v2445_v12, %v139_v41  ;;  %2094 = vmatmul.mubr.msk.bf16.vlgmr.msra.gmra.mxu0 %vm157_vm4, %v851_v40 }
 0x38b   :  { %v1844_v42 = vsel %vm143_vm5, 1.0, %v2360_v7  ;;  %2097 = vmatprep.mubr.msk.bf16.mxu0 %vm2361_vm15, %v2360_v7 }
 0x38c   :  { %2107 = vmatprep.mubr.msk.f32.mxu1 %vm929_vm3, %v1844_v42  ;;  %v1156_v42 = vld [vmem:[%s3004_s3 + $0x70] sm:$0xff] }
 0x38d   :  { %v142_v43 = vpop.permute.xlu1 %141  ;;  %v855_v49 = vpop.permute.xlu0 %854 }
 0x38e   :  { %vm144_vm6 = vcmp.eq.s32.totalorder %v2445_v12, %v142_v43  ;;  %v1157_v43 = vld [vmem:[%s3004_s3 + $0x78] sm:$0xff] }
 0x38f   :  { %v1845_v45 = vsel %vm144_vm6, 1.0, %v2360_v7 }
 0x390   :  { %2108 = vmatmul.mubr.msk.f32.vlgmr.msra.gmra.mxu1 %vm929_vm3, %v1845_v45  ;;  %v1154_v45 = vld [vmem:[%s3004_s3 + $0x60] sm:$0xff] }
 0x391   :  { %v853_v47 = vpop.permute.xlu1 %852  ;;  %2130 = vmatprep.mubr.msk.bf16.mxu1 %vm2361_vm15, %v2360_v7 }
 0x392   :  { %2098 = vmatmul.mubr.msk.bf16.gmra.mxu0 %vm157_vm4, %v853_v47  ;;  %v1162_v47 = vpack.c.bf16 %v1157_v43, %v1156_v42 }
 0x393   :  { %2101 = vmatprep.mubr.msk.bf16.mxu0 %vm2361_vm15, %v2360_v7 }
 0x39a   :  { %2102 = vmatmul.mubr.msk.bf16.gmra.mxu0 %vm157_vm4, %v855_v49  ;;  %v1155_v49 = vld [vmem:[%s3004_s3 + $0x68] sm:$0xff] }
 0x39b   :  { %2112 = vmatprep.mubr.msk.bf16.mxu0 %vm2361_vm15, %v2360_v7 }
 0x3c2   :  { %v2649_v50 = vpop.f32.mrf.mxu0 }
 0x3c4   :  { %v2067_v51 = vpop.f32.mrf.mxu0 }
 0x3c5   :  { %v1161_v51 = vpack.c.bf16 %v1155_v49, %v1154_v45 }
 0x3c6   :  { %v2651_v53 = vpop.f32.mrf.mxu0 }
 0x3c8   :  { %v2068_v55 = vpop.f32.mrf.mxu0 }
 0x3c9   :  { %v1152_v55 = vld [vmem:[%s3004_s3 + $0x50] sm:$0xff] }
 0x3ca   :  { %v2653_v56 = vpop.f32.mrf.mxu0 }
 0x3cc   :  { %v2071_v57 = vpop.f32.mrf.mxu0 }
 0x3cd   :  { %v1153_v57 = vld [vmem:[%s3004_s3 + $0x58] sm:$0xff] }
 0x3ce   :  { %v2655_v59 = vpop.f32.mrf.mxu0 }
 0x3d0   :  { %v2072_v61 = vpop.f32.mrf.mxu0 }
 0x3d1   :  { %v1160_v61 = vpack.c.bf16 %v1153_v57, %v1152_v55  ;;  %v2742_v55 = vadd.s32 8, %v2578_v48 }
 0x3d3   :  { %v2657_v46 = vpop.f32.mrf.mxu0 }
 0x3d5   :  { %v2075_v63 = vpop.f32.mrf.mxu0 }
 0x3d6   :  { %v1870_v63 = vld [vmem:[%s3004_s3 + $0x125] ss:$0 sm:$0xff] }
 0x3d7   :  { %v2659_v4 = vpop.f32.mrf.mxu0 }
 0x3d9   :  { %v2076_v13 = vpop.f32.mrf.mxu0 }
 0x3da   :  { %v725_v13 = vadd.f32 %v1870_v63, %v2649_v50 }
 0x435   :  { %v2661_v15 = vpop.f32.mrf.mxu1 }
 0x437   :  { %v2081_v11 = vpop.f32.mrf.mxu1 }
 0x438   :  { %v728_v11 = vadd.f32 %v1870_v63, %v2651_v53 }
 0x439   :  { %v2663_v19 = vpop.f32.mrf.mxu1 }
 0x43a   :  { %v748_v2 = vmul.f32 %v728_v11, %v2585_v3  ;;  %v1151_v11 = vld [vmem:[%s3004_s3 + $0x48] sm:$0xff] }
 0x43b   :  { %v2082_v20 = vpop.f32.mrf.mxu1 }
 0x43d   :  { %v2665_v22 = vpop.f32.mrf.mxu1 }
 0x43f   :  { %v2085_v6 = vpop.f32.mrf.mxu1 }
 0x441   :  { %v2667_v24 = vpop.f32.mrf.mxu1 }
 0x443   :  { %v2086_v54 = vpop.f32.mrf.mxu1 }
 0x444   :  { %v747_v54 = vmul.f32 %v725_v13, %v2587_v5  ;;  %v1150_v13 = vld [vmem:[%s3004_s3 + $0x40] sm:$0xff] }
 0x446   :  { %v2674_v23 = vpop.f32.mrf.mxu1 }
 0x448   :  { %v2089_v8 = vpop.f32.mrf.mxu1 }
 0x44a   :  { %v2677_v10 = vpop.f32.mrf.mxu1  ;;  %v2679_v27 = vpop.f32.mrf.mxu0 }
 0x44c   :  { %v2090_v29 = vpop.f32.mrf.mxu1  ;;  %v2095_v52 = vpop.f32.mrf.mxu0 }
 0x44d   :  { %v733_v52 = vadd.f32 %v1870_v63, %v2653_v56 }
 0x44e   :  { %v2681_v30 = vpop.f32.mrf.mxu0 }
 0x44f   :  { %v749_v50 = vmul.f32 %v733_v52, %v2591_v16 }
 0x450   :  { %v2096_v32 = vpop.f32.mrf.mxu0  ;;  %v2109_v34 = vpop.f32.mrf.mxu1 }
 0x451   :  { %v1024_v36 = vmul.f32 %v2109_v34, %v1022_v31 }
 0x452   :  { %v2684_v35 = vpop.f32.mrf.mxu0  ;;  %v1006_v9 = vpop.f32.mrf.mxu1 }
 0x453   :  { %v1023_v60 = vmul.f32 %v1022_v31, %v1006_v9  ;;  %v736_v31 = vadd.f32 %v1870_v63, %v2655_v59 }
 0x454   :  { %v2099_v37 = vpop.f32.mrf.mxu0 }
 0x455   :  { %v1026_v38 = vpack.c.bf16 %v1024_v36, %v1023_v60  ;;  %v750_v53 = vmul.f32 %v736_v31, %v2589_v14 }
 0x456   :  { %v2686_v58 = vpop.f32.mrf.mxu0 }
 0x457   :  { %2111 = vmatpush3.bf16.msra.mxu0 %v1026_v38 }
 0x458   :  { %v2100_v39 = vpop.f32.mrf.mxu0  ;;  %2134 = vmatprep.subr.bf16.mxu0 %v2360_v7 }
 0x459   :  { %v741_v39 = vadd.f32 %v1870_v63, %v2657_v46  ;;  %v1841_v46 = vld [vmem:[%s3003_s2 + $0x30] ss:$0 sm:$0xff] }
 0x45a   :  { %v2689_v0 = vpop.f32.mrf.mxu0  ;;  %2113 = vmatmul.mubr.msk.bf16.vlgmr.msra.gmra.mxu0 %vm157_vm4, %v2451_v17  ;;  %vm130_vm7 = vcmp.eq.s32.totalorder %v2578_v48, %v1841_v46  ;;  %vm131_vm8 = vcmp.eq.s32.totalorder %v2742_v55, %v1841_v46 }
 0x45b   :  { %2116 = vmatprep.mubr.msk.bf16.mxu0 %vm2361_vm15, %v2360_v7  ;;  %2135 = vmatpush3.bf16.msra.mxu0 %v1162_v47  ;;  %v751_v59 = vmul.f32 %v741_v39, %v2595_v21  ;;  %v1232_v39 = vld [vmem:[%s3004_s3 + $0x12a] sm:$0x3] }
 0x45c   :  { %v2103_v1 = vpop.f32.mrf.mxu0  ;;  %2136 = vmatprep.subr.bf16.mxu0 %v2360_v7 }
 0x45d   :  { %v744_v1 = vadd.f32 %v1870_v63, %v2659_v4  ;;  %v1842_v4 = vsel %vm130_vm7, 1.0, %v2360_v7 }
 0x45e   :  { %v2695_v40 = vpop.f32.mrf.mxu0 }
 0x45f   :  { %2137 = vmatpush3.bf16.msra.mxu0 %v1161_v51  ;;  %v752_v43 = vmul.f32 %v744_v1, %v2593_v18 }
 0x460   :  { %v2104_v41 = vpop.f32.mrf.mxu0  ;;  %2138 = vmatprep.subr.bf16.mxu0 %v2360_v7 }
 0x462   :  { %2117 = vmatmul.mubr.msk.bf16.gmra.mxu0 %vm157_vm4, %v2468_v33 }
 0x463   :  { %2120 = vmatprep.mubr.msk.bf16.mxu0 %vm2361_vm15, %v2360_v7  ;;  %2139 = vmatpush3.bf16.msra.mxu0 %v1160_v61  ;;  %v1843_v61 = vsel %vm131_vm8, 1.0, %v2360_v7 }
 0x464   :  { %2140 = vmatprep.subr.bf16.mxu0 %v2360_v7  ;;  %v2753_v63 = vpack.c.bf16 %v1843_v61, %v1842_v4 }
 0x46a   :  { %2121 = vmatmul.mubr.msk.bf16.gmra.mxu0 %vm157_vm4, %v2480_v44 }
 0x46b   :  { %2144 = vmatprep.mubr.msk.bf16.mxu0 %vm2361_vm15, %v2360_v7 }
 0x51a   :  { %v1070_v20 = vpop.f32.mrf.mxu0 }
 0x51b   :  { %v1093_v8 = vmul.f32 %v1070_v20, %v747_v54  ;;  %v1159_v20 = vpack.c.bf16 %v1151_v11, %v1150_v13  ;;  %v1149_v54 = vld [vmem:[%s3004_s3 + $0x38] sm:$0xff] }
 0x51c   :  { %v2114_v6 = vpop.f32.mrf.mxu0 }
 0x51d   :  { %2141 = vmatpush3.bf16.msra.mxu0 %v1159_v20  ;;  %v1148_v6 = vld [vmem:[%s3004_s3 + $0x30] sm:$0xff] }
 0x51e   :  { %v1073_v26 = vpop.f32.mrf.mxu0  ;;  %2142 = vmatprep.subr.bf16.mxu0 %v2360_v7 }
 0x51f   :  { %v1094_v28 = vmul.f32 %v1073_v26, %v748_v2  ;;  %v1158_v2 = vpack.c.bf16 %v1149_v54, %v1148_v6  ;;  %v1376_v6 = vld [vmem:[%s3004_s3 + $0xc0] sm:$0xff]  ;;  %v1377_v54 = vld [vmem:[%s3004_s3 + $0xc8] sm:$0xff] }
 0x520   :  { %v2115_v29 = vpop.f32.mrf.mxu0 }
 0x521   :  { %v1099_v32 = vpack.c.bf16 %v1094_v28, %v1093_v8  ;;  %2143 = vmatpush3.bf16.msra.mxu0 %v1158_v2  ;;  %v1374_v2 = vld [vmem:[%s3004_s3 + $0xb0] sm:$0xff] }
 0x522   :  { %v1078_v34 = vpop.f32.mrf.mxu0  ;;  %2162 = vmatprep.subr.bf16.mxu0 %v2360_v7 }
 0x523   :  { %v1095_v60 = vmul.f32 %v1078_v34, %v749_v50 }
 0x524   :  { %v2118_v9 = vpop.f32.mrf.mxu0 }
 0x526   :  { %v1081_v36 = vpop.f32.mrf.mxu0 }
 0x527   :  { %v1096_v37 = vmul.f32 %v1081_v36, %v750_v53 }
 0x528   :  { %v2119_v38 = vpop.f32.mrf.mxu0 }
 0x529   :  { %v1100_v41 = vpack.c.bf16 %v1096_v37, %v1095_v60 }
 0x52a   :  { %v1086_v42 = vpop.f32.mrf.mxu0 }
 0x52b   :  { %v1097_v47 = vmul.f32 %v1086_v42, %v751_v59 }
 0x52c   :  { %v2122_v56 = vpop.f32.mrf.mxu0 }
 0x52d   :  { %v1251_v56 = vmul.f32 %v1232_v39, %v2672_v25 }
 0x52e   :  { %v1089_v45 = vpop.f32.mrf.mxu0 }
 0x52f   :  { %v1098_v49 = vmul.f32 %v1089_v45, %v752_v43 }
 0x530   :  { %v2123_v51 = vpop.f32.mrf.mxu0 }
 0x531   :  { %v1101_v57 = vpack.c.bf16 %v1098_v49, %v1097_v47  ;;  %v2787_v47 = vadd.f32 1.0, %v1251_v56 }
 0x533   :  { %2125 = vmatpush3.bf16.msra.mxu1 %v1101_v57  ;;  %v1256_v46 = vrot.slane %v2787_v47, %v2581_v62 }
 0x534   :  { %2126 = vmatprep.subr.bf16.mxu1 %v2360_v7 }
 0x537   :  { %2127 = vmatpush3.bf16.msra.mxu1 %v1100_v41  ;;  %v2783_v41 = vld [vmem:[%s3004_s3 + $0x128] ss:$0 sm:$0xff] }
 0x538   :  { %2128 = vmatprep.subr.bf16.mxu1 %v2360_v7 }
 0x53b   :  { %2129 = vmatpush3.bf16.msra.mxu1 %v1099_v32 }
 0x53c   :  { %2148 = vmatprep.subr.bf16.mxu1 %v2360_v7 }
 0x53e   :  { %2131 = vmatmul.mubr.msk.bf16.vlgmr.msra.gmra.mxu1 %vm1102_vm9, %v2753_v63 }
 0x53f   :  { %2150 = vmatprep.mubr.msk.bf16.mxu1 %vm2361_vm15, %v2360_v7 }
 0x5fe   :  { %v1140_v26 = vpop.f32.mrf.mxu1 }
 0x600   :  { %v2132_v8 = vpop.f32.mrf.mxu1 }
 0x601   :  { %v1375_v8 = vld [vmem:[%s3004_s3 + $0xb8] sm:$0xff] }
 0x602   :  { %v1143_v28 = vpop.f32.mrf.mxu1 }
 0x603   :  { %v1147_v29 = vpack.c.bf16 %v1143_v28, %v1140_v26  ;;  %v1382_v26 = vpack.c.bf16 %v1377_v54, %v1376_v6  ;;  %v1381_v28 = vpack.c.bf16 %v1375_v8, %v1374_v2 }
 0x604   :  { %v2133_v52 = vpop.f32.mrf.mxu1 }
 0x605   :  { %2145 = vmatmul.mubr.msk.bf16.vlgmr.msra.gmra.mxu0 %vm1163_vm10, %v1147_v29  ;;  %v1372_v29 = vld [vmem:[%s3004_s3 + $0xa0] sm:$0xff]  ;;  %v1373_v52 = vld [vmem:[%s3004_s3 + $0xa8] sm:$0xff] }
 0x606   :  { %2168 = vmatprep.mubr.msk.bf16.mxu0 %vm2361_vm15, %v2360_v7 }
 0x6c5   :  { %v1201_v31 = vpop.f32.mrf.mxu0 }
 0x6c6   :  { %v1890_v32 = vmul.f32 -1.442695, %v1201_v31 }
 0x6c7   :  { %v2146_v34 = vpop.f32.mrf.mxu0 }
 0x6c8   :  { %2313 = vpow2.f32 %v1890_v32  ;;  %v1874_v32 = vld [vmem:[%s3004_s3 + $0x126] ss:$0 sm:$0xff] }
 0x6c9   :  { %v1204_v9 = vpop.f32.mrf.mxu0  ;;  %v814_v34 = vadd.f32 %v1874_v32, %v2661_v15  ;;  %v825_v56 = vadd.f32 %v1874_v32, %v2667_v24 }
 0x6ca   :  { %v1891_v50 = vmul.f32 -1.442695, %v1204_v9 }
 0x6cb   :  { %v2147_v53 = vpop.f32.mrf.mxu0 }
 0x6cc   :  { %2315 = vpow2.f32 %v1891_v50 }
 0x6d5   :  { %v2314_v36 = vpop.eup %2313 }
 0x6d6   :  { %v1214_v60 = vadd.f32 1.0, %v2314_v36  ;;  %v836_v36 = vmul.f32 %v814_v34, %v2587_v5 }
 0x6d8   :  { %2317 = vrcp.f32 %v1214_v60 }
 0x6d9   :  { %v2316_v37 = vpop.eup %2315 }
 0x6da   :  { %v1215_v38 = vadd.f32 1.0, %v2316_v37 }
 0x6dc   :  { %2319 = vrcp.f32 %v1215_v38 }
 0x6e5   :  { %v2318_v1 = vpop.eup %2317 }
 0x6e6   :  { %v1892_v42 = vadd.f32 -1.0, %v2318_v1 }
 0x6e8   :  { %v1226_v59 = vmul.f32 %v2783_v41, %v1892_v42  ;;  %v822_v42 = vadd.f32 %v1874_v32, %v2665_v22 }
 0x6e9   :  { %v2320_v43 = vpop.eup %2319 }
 0x6ea   :  { %v1228_v45 = vadd.f32 1.0, %v1226_v59  ;;  %v1893_v49 = vadd.f32 -1.0, %v2320_v43  ;;  %v838_v15 = vmul.f32 %v822_v42, %v2591_v16 }
 0x6ec   :  { %v1227_v51 = vmul.f32 %v2783_v41, %v1893_v49  ;;  %v2790_v57 = vmul.f32 %v1228_v45, %v1201_v31  ;;  %v1380_v31 = vpack.c.bf16 %v1373_v52, %v1372_v29 }
 0x6ee   :  { %v1229_v4 = vadd.f32 1.0, %v1227_v51  ;;  %v1257_v13 = vmul.f32 %v1256_v46, %v2790_v57 }
 0x6f0   :  { %v2794_v61 = vmul.f32 %v1229_v4, %v1204_v9  ;;  %v817_v9 = vadd.f32 %v1874_v32, %v2663_v19  ;;  %v839_v19 = vmul.f32 %v825_v56, %v2589_v14 }
 0x6f2   :  { %v1258_v11 = vmul.f32 %v1256_v46, %v2794_v61  ;;  %v837_v60 = vmul.f32 %v817_v9, %v2585_v3 }
 0x6f4   :  { %v1259_v20 = vpack.c.bf16 %v1258_v11, %v1257_v13  ;;  %v830_v13 = vadd.f32 %v1874_v32, %v2674_v23  ;;  %v833_v11 = vadd.f32 %v1874_v32, %v2677_v10  ;;  %v1370_v23 = vld [vmem:[%s3004_s3 + $0x90] sm:$0xff]  ;;  %v1371_v10 = vld [vmem:[%s3004_s3 + $0x98] sm:$0xff]  ;;  %v1369_v32 = vld [vmem:[%s3004_s3 + $0x88] sm:$0xff] }
 0x6f5   :  { %v1379_v52 = vpack.c.bf16 %v1371_v10, %v1370_v23 }
 0x6f6   :  { %2149 = vmatpush3.bf16.msra.mxu1 %v1259_v20  ;;  %v840_v24 = vmul.f32 %v830_v13, %v2595_v21  ;;  %v841_v54 = vmul.f32 %v833_v11, %v2593_v18 }
 0x6f7   :  { %2172 = vmatprep.subr.bf16.mxu1 %v2360_v7 }
 0x6f9   :  { %2151 = vmatmul.mubr.msk.bf16.vlgmr.msra.gmra.mxu1 %vm157_vm4, %v2451_v17 }
 0x6fa   :  { %2154 = vmatprep.mubr.msk.bf16.mxu1 %vm2361_vm15, %v2360_v7  ;;  %2173 = vmatpush3.bf16.msra.mxu1 %v1382_v26 }
 0x6fb   :  { %2174 = vmatprep.subr.bf16.mxu1 %v2360_v7 }
 0x6fe   :  { %2175 = vmatpush3.bf16.msra.mxu1 %v1381_v28 }
 0x6ff   :  { %2176 = vmatprep.subr.bf16.mxu1 %v2360_v7 }
 0x701   :  { %2155 = vmatmul.mubr.msk.bf16.gmra.mxu1 %vm157_vm4, %v2468_v33 }
 0x702   :  { %2158 = vmatprep.mubr.msk.bf16.mxu1 %vm2361_vm15, %v2360_v7  ;;  %2177 = vmatpush3.bf16.msra.mxu1 %v1380_v31  ;;  %v1368_v31 = vld [vmem:[%s3004_s3 + $0x80] sm:$0xff] }
 0x703   :  { %2178 = vmatprep.subr.bf16.mxu1 %v2360_v7  ;;  %v1378_v34 = vpack.c.bf16 %v1369_v32, %v1368_v31 }
 0x706   :  { %2179 = vmatpush3.bf16.msra.mxu1 %v1379_v52 }
 0x707   :  { %2180 = vmatprep.subr.bf16.mxu1 %v2360_v7 }
 0x709   :  { %2159 = vmatmul.mubr.msk.bf16.gmra.mxu1 %vm157_vm4, %v2480_v44 }
 0x70a   :  { %2182 = vmatprep.mubr.msk.bf16.mxu1 %vm2361_vm15, %v2360_v7  ;;  %2181 = vmatpush3.bf16.msra.mxu1 %v1378_v34 }
 0x70b   :  { %2200 = vmatprep.subr.bf16.mxu1 %v2360_v7 }
 0x7b9   :  { %v1294_v50 = vpop.f32.mrf.mxu1 }
 0x7ba   :  { %v1317_v38 = vmul.f32 %v1294_v50, %v836_v36 }
 0x7bb   :  { %v2152_v53 = vpop.f32.mrf.mxu1 }
 0x7bd   :  { %v1297_v37 = vpop.f32.mrf.mxu1 }
 0x7be   :  { %v1318_v39 = vmul.f32 %v1297_v37, %v837_v60  ;;  %v1233_v37 = vld [vmem:[%s3004_s3 + $0x12c] sm:$0x3] }
 0x7bf   :  { %v2153_v1 = vpop.f32.mrf.mxu1 }
 0x7c0   :  { %v1323_v59 = vpack.c.bf16 %v1318_v39, %v1317_v38  ;;  %v1234_v38 = vmul.f32 %v1233_v37, %v2672_v25 }
 0x7c1   :  { %v1302_v43 = vpop.f32.mrf.mxu1 }
 0x7c2   :  { %v1319_v51 = vmul.f32 %v1302_v43, %v838_v15  ;;  %v1895_v39 = vmul.f32 -1.442695, %v1234_v38 }
 0x7c3   :  { %v2156_v45 = vpop.f32.mrf.mxu1 }
 0x7c4   :  { %2321 = vpow2.f32 %v1895_v39 }
 0x7c5   :  { %v1305_v49 = vpop.f32.mrf.mxu1 }
 0x7c6   :  { %v1320_v46 = vmul.f32 %v1305_v49, %v839_v19 }
 0x7c7   :  { %v2157_v4 = vpop.f32.mrf.mxu1 }
 0x7c8   :  { %v1324_v20 = vpack.c.bf16 %v1320_v46, %v1319_v51 }
 0x7c9   :  { %v1310_v6 = vpop.f32.mrf.mxu1 }
 0x7ca   :  { %v1321_v26 = vmul.f32 %v1310_v6, %v840_v24 }
 0x7cb   :  { %v2160_v22 = vpop.f32.mrf.mxu1 }
 0x7cd   :  { %v1313_v2 = vpop.f32.mrf.mxu1 }
 0x7ce   :  { %v1322_v8 = vmul.f32 %v1313_v2, %v841_v54 }
 0x7cf   :  { %v2161_v28 = vpop.f32.mrf.mxu1 }
 0x7d0   :  { %v1325_v29 = vpack.c.bf16 %v1322_v8, %v1321_v26 }
 0x7d1   :  { %v2322_v1 = vpop.eup %2321 }
 0x7d2   :  { %2163 = vmatpush3.bf16.msra.mxu0 %v1325_v29  ;;  %v1238_v42 = vadd.f32 1.0, %v2322_v1 }
 0x7d3   :  { %2164 = vmatprep.subr.bf16.mxu0 %v2360_v7 }
 0x7d4   :  { %2323 = vrcp.f32 %v1238_v42 }
 0x7d6   :  { %2165 = vmatpush3.bf16.msra.mxu0 %v1324_v20 }
 0x7d7   :  { %2166 = vmatprep.subr.bf16.mxu0 %v2360_v7 }
 0x7da   :  { %2167 = vmatpush3.bf16.msra.mxu0 %v1323_v59 }
 0x7db   :  { %2186 = vmatprep.subr.bf16.mxu0 %v2360_v7 }
 0x7dd   :  { %2169 = vmatmul.mubr.msk.bf16.vlgmr.msra.gmra.mxu0 %vm1102_vm9, %v2753_v63 }
 0x7de   :  { %2188 = vmatprep.mubr.msk.bf16.mxu0 %vm2361_vm15, %v2360_v7 }
 0x7e1   :  { %v2875_v56 = vpop.eup %2323 }
 0x7e2   :  { %v1241_v59 = vmul.f32 %v2875_v56, %v2875_v56  ;;  %v1450_v31 = vrot.slane %v2875_v56, %v2581_v62 }
 0x7e4   :  { %v1242_v19 = vsub.f32 1.0, %v1241_v59  ;;  %v1452_v37 = vmul.f32 %v1450_v31, %v2794_v61 }
 0x7e6   :  { %v1243_v4 = vmax.f32 %v1242_v19, 0.0 }
 0x7e8   :  { %vm1246_vm11 = vcmp.eq.f32.partialorder %v1243_v4, inf  ;;  %v1249_v24 = vand.u32 2147483648, %v1243_v4  ;;  %vm1248_vm12 = vcmp.eq.f32.partialorder %v1243_v4, 0.0 }
 0x89d   :  { %v1360_v9 = vpop.f32.mrf.mxu0 }
 0x89f   :  { %v2170_v50 = vpop.f32.mrf.mxu0 }
 0x8a0   :  { %v2888_v50 = vsub.s32 1, %v2578_v48 }
 0x8a1   :  { %v1363_v53 = vpop.f32.mrf.mxu0 }
 0x8a2   :  { %v1367_v36 = vpack.c.bf16 %v1363_v53, %v1360_v9  ;;  %v1464_v39 = vrot.slane %v2787_v47, %v2888_v50  ;;  %v1584_v47 = vld [vmem:[%s3004_s3 + $0x110] sm:$0xff] }
 0x8a3   :  { %v2171_v60 = vpop.f32.mrf.mxu0 }
 0x8a4   :  { %2183 = vmatmul.mubr.msk.bf16.vlgmr.msra.gmra.mxu1 %vm1163_vm10, %v1367_v36  ;;  %v1451_v36 = vmul.f32 %v1450_v31, %v2790_v57 }
 0x8a5   :  { %2206 = vmatprep.mubr.msk.bf16.mxu1 %vm2361_vm15, %v2360_v7 }
 0x964   :  { %v1420_v43 = vpop.f32.mrf.mxu1 }
 0x965   :  { %v1901_v45 = vmul.f32 -1.442695, %v1420_v43 }
 0x966   :  { %v2184_v15 = vpop.f32.mrf.mxu1 }
 0x967   :  { %2325 = vpow2.f32 %v1901_v45  ;;  %v1580_v45 = vld [vmem:[%s3004_s3 + $0xf0] sm:$0xff]  ;;  %v1581_v15 = vld [vmem:[%s3004_s3 + $0xf8] sm:$0xff] }
 0x968   :  { %v1423_v49 = vpop.f32.mrf.mxu1  ;;  %v1588_v19 = vpack.c.bf16 %v1581_v15, %v1580_v45  ;;  %v1672_v45 = vadd.s32 40, %v2578_v48  ;;  %v1671_v15 = vadd.s32 32, %v2578_v48 }
 0x969   :  { %v1902_v51 = vmul.f32 -1.442695, %v1423_v49 }
 0x96a   :  { %v2185_v46 = vpop.f32.mrf.mxu1 }
 0x96b   :  { %2327 = vpow2.f32 %v1902_v51 }
 0x96c   :  { %2329 = vrsqrt.f32 %v1243_v4 }
 0x974   :  { %v2326_v25 = vpop.eup %2325 }
 0x975   :  { %v1433_v13 = vadd.f32 1.0, %v2326_v25 }
 0x977   :  { %2331 = vrcp.f32 %v1433_v13 }
 0x978   :  { %v2328_v11 = vpop.eup %2327 }
 0x979   :  { %v1434_v20 = vadd.f32 1.0, %v2328_v11  ;;  %v2330_v6 = vpop.eup %2329 }
 0x97a   :  { %v1245_v22 = vmul.f32 %v2330_v6, %v1243_v4 }
 0x97b   :  { %2333 = vrcp.f32 %v1434_v20 }
 0x97c   :  { %v1247_v54 = vsel %vm1246_vm11, %v1243_v4, %v1245_v22 }
 0x97d   :  { %v2879_v8 = vsel %vm1248_vm12, %v1249_v24, %v1247_v54 }
 0x97e   :  { %v1456_v10 = vrot.slane %v2879_v8, %v2581_v62 }
 0x984   :  { %v2332_v2 = vpop.eup %2331 }
 0x985   :  { %v1903_v26 = vadd.f32 -1.0, %v2332_v2 }
 0x987   :  { %v1441_v28 = vmul.f32 %v1903_v26, %v2783_v41 }
 0x988   :  { %v2334_v29 = vpop.eup %2333 }
 0x989   :  { %v1443_v23 = vadd.f32 1.0, %v1441_v28  ;;  %v1904_v52 = vadd.f32 -1.0, %v2334_v29 }
 0x98b   :  { %v1445_v32 = vmul.f32 %v1443_v23, %v1420_v43  ;;  %v1442_v34 = vmul.f32 %v1904_v52, %v2783_v41 }
 0x98d   :  { %v1457_v9 = vmul.f32 %v1456_v10, %v1445_v32  ;;  %v1444_v53 = vadd.f32 1.0, %v1442_v34 }
 0x98f   :  { %v1446_v60 = vmul.f32 %v1444_v53, %v1423_v49  ;;  %v2892_v38 = vadd.f32 %v1457_v9, %v1451_v36  ;;  %v1878_v49 = vld [vmem:[%s3004_s3 + $0x127] ss:$0 sm:$0xff] }
 0x990   :  { %v900_v51 = vadd.f32 %v1878_v49, %v2679_v27  ;;  %v903_v46 = vadd.f32 %v1878_v49, %v2681_v30  ;;  %v908_v54 = vadd.f32 %v1878_v49, %v2684_v35  ;;  %v911_v2 = vadd.f32 %v1878_v49, %v2686_v58 }
 0x991   :  { %v1458_v1 = vmul.f32 %v1456_v10, %v1446_v60  ;;  %v1465_v42 = vmul.f32 %v1464_v39, %v2892_v38  ;;  %v919_v31 = vadd.f32 %v1878_v49, %v2695_v40  ;;  %v1576_v40 = vld [vmem:[%s3004_s3 + $0xd0] sm:$0xff] }
 0x992   :  { %v922_v13 = vmul.f32 %v900_v51, %v2587_v5  ;;  %v923_v11 = vmul.f32 %v903_v46, %v2585_v3  ;;  %v924_v27 = vmul.f32 %v908_v54, %v2591_v16  ;;  %v925_v30 = vmul.f32 %v911_v2, %v2589_v14 }
 0x993   :  { %v2896_v62 = vadd.f32 %v1458_v1, %v1452_v37  ;;  %v916_v3 = vadd.f32 %v1878_v49, %v2689_v0  ;;  %v927_v9 = vmul.f32 %v919_v31, %v2593_v18  ;;  %v1579_v18 = vld [vmem:[%s3004_s3 + $0xe8] sm:$0xff]  ;;  %v1669_v49 = vadd.s32 16, %v2578_v48 }
 0x995   :  { %v1466_v59 = vmul.f32 %v1464_v39, %v2896_v62  ;;  %v926_v58 = vmul.f32 %v916_v3, %v2595_v21  ;;  %v1578_v21 = vld [vmem:[%s3004_s3 + $0xe0] sm:$0xff]  ;;  %v1924_v3 = vld [vmem:[%s3004_s3 + $0x12e] ss:$0 sm:$0xff] }
 0x996   :  { %v1587_v0 = vpack.c.bf16 %v1579_v18, %v1578_v21 }
 0x997   :  { %v1467_v43 = vpack.c.bf16 %v1466_v59, %v1465_v42 }
 0x999   :  { %2187 = vmatpush3.bf16.msra.mxu0 %v1467_v43 }
 0x99a   :  { %2210 = vmatprep.subr.bf16.mxu0 %v2360_v7 }
 0x99c   :  { %2189 = vmatmul.mubr.msk.bf16.vlgmr.msra.gmra.mxu0 %vm157_vm4, %v2451_v17  ;;  %v1585_v17 = vld [vmem:[%s3004_s3 + $0x118] sm:$0xff] }
 0x99d   :  { %2192 = vmatprep.mubr.msk.bf16.mxu0 %vm2361_vm15, %v2360_v7  ;;  %v1590_v57 = vpack.c.bf16 %v1585_v17, %v1584_v47  ;;  %v1677_v47 = vadd.s32 1, %v2445_v12  ;;  %v1676_v17 = vadd.s32 72, %v2578_v48  ;;  %v1673_v12 = vadd.s32 48, %v2578_v48 }
 0x99f   :  { %2211 = vmatpush3.bf16.msra.mxu0 %v1590_v57  ;;  %v1675_v57 = vadd.s32 64, %v2578_v48 }
 0x9a0   :  { %2212 = vmatprep.subr.bf16.mxu0 %v2360_v7 }
 0x9a4   :  { %2193 = vmatmul.mubr.msk.bf16.gmra.mxu0 %vm157_vm4, %v2468_v33  ;;  %v1582_v33 = vld [vmem:[%s3004_s3 + $0x100] sm:$0xff] }
 0x9a5   :  { %2196 = vmatprep.mubr.msk.bf16.mxu0 %vm2361_vm15, %v2360_v7 }
 0x9ac   :  { %2197 = vmatmul.mubr.msk.bf16.gmra.mxu0 %vm157_vm4, %v2480_v44  ;;  %v1583_v44 = vld [vmem:[%s3004_s3 + $0x108] sm:$0xff] }
 0x9ad   :  { %2220 = vmatprep.mubr.msk.bf16.mxu0 %vm2361_vm15, %v2360_v7  ;;  %v1589_v61 = vpack.c.bf16 %v1583_v44, %v1582_v33  ;;  %v2366_v44 = vmov 1.0  }
 0x9af   :  { %2213 = vmatpush3.bf16.msra.mxu0 %v1589_v61  ;;  %v1674_v61 = vadd.s32 56, %v2578_v48 }
 0x9b0   :  { %2214 = vmatprep.subr.bf16.mxu0 %v2360_v7 }
 0x9b3   :  { %2215 = vmatpush3.bf16.msra.mxu0 %v1588_v19  ;;  %v1670_v19 = vadd.s32 24, %v2578_v48 }
 0x9b4   :  { %2216 = vmatprep.subr.bf16.mxu0 %v2360_v7 }
 0x9b7   :  { %2217 = vmatpush3.bf16.msra.mxu0 %v1587_v0 }
 0x9b8   :  { %2218 = vmatprep.subr.bf16.mxu0 %v2360_v7 }
 0xa5c   :  { %v1502_v4 = vpop.f32.mrf.mxu0 }
 0xa5d   :  { %v1525_v6 = vmul.f32 %v1502_v4, %v922_v13 }
 0xa5e   :  { %v2190_v25 = vpop.f32.mrf.mxu0 }
 0xa60   :  { %v1505_v20 = vpop.f32.mrf.mxu0 }
 0xa61   :  { %v1526_v22 = vmul.f32 %v1505_v20, %v923_v11 }
 0xa62   :  { %v2191_v24 = vpop.f32.mrf.mxu0 }
 0xa63   :  { %v1531_v26 = vpack.c.bf16 %v1526_v22, %v1525_v6 }
 0xa64   :  { %v1510_v28 = vpop.f32.mrf.mxu0 }
 0xa65   :  { %v1527_v10 = vmul.f32 %v1510_v28, %v924_v27  ;;  %v1658_v28 = vrot.slane %v2875_v56, %v2888_v50 }
 0xa66   :  { %v2194_v29 = vpop.f32.mrf.mxu0 }
 0xa67   :  { %v1664_v29 = vrot.slane %v2879_v8, %v2888_v50 }
 0xa68   :  { %v1513_v23 = vpop.f32.mrf.mxu0 }
 0xa69   :  { %v1528_v5 = vmul.f32 %v1513_v23, %v925_v30 }
 0xa6a   :  { %v2195_v52 = vpop.f32.mrf.mxu0 }
 0xa6b   :  { %v1532_v32 = vpack.c.bf16 %v1528_v5, %v1527_v10  ;;  %v1659_v10 = vmul.f32 %v1658_v28, %v2892_v38 }
 0xa6c   :  { %v1518_v34 = vpop.f32.mrf.mxu0 }
 0xa6d   :  { %v1529_v36 = vmul.f32 %v1518_v34, %v926_v58  ;;  %v1660_v34 = vmul.f32 %v1658_v28, %v2896_v62 }
 0xa6e   :  { %v2198_v35 = vpop.f32.mrf.mxu0 }
 0xa70   :  { %v1521_v53 = vpop.f32.mrf.mxu0 }
 0xa71   :  { %v1530_v16 = vmul.f32 %v1521_v53, %v927_v9 }
 0xa72   :  { %v2199_v60 = vpop.f32.mrf.mxu0 }
 0xa73   :  { %v1533_v14 = vpack.c.bf16 %v1530_v16, %v1529_v36 }
 0xa75   :  { %2201 = vmatpush3.bf16.msra.mxu1 %v1533_v14 }
 0xa76   :  { %2202 = vmatprep.subr.bf16.mxu1 %v2360_v7 }
 0xa79   :  { %2203 = vmatpush3.bf16.msra.mxu1 %v1532_v32 }
 0xa7a   :  { %2204 = vmatprep.subr.bf16.mxu1 %v2360_v7  ;;  %v1678_v7 = vmul.u32 8, %v1677_v47 }
 0xa7c   :  { %v1689_v33 = vadd.s32 8, %v1678_v7  ;;  %vm1688_vm4 = vcmp.ge.s32.totalorder %v1676_v17, %v1678_v7  ;;  %vm1687_vm0 = vcmp.ge.s32.totalorder %v1675_v57, %v1678_v7  ;;  %vm1686_vm3 = vcmp.ge.s32.totalorder %v1674_v61, %v1678_v7 }
 0xa7d   :  { %2205 = vmatpush3.bf16.msra.mxu1 %v1531_v26  ;;  %vm1685_vm7 = vcmp.ge.s32.totalorder %v1673_v12, %v1678_v7  ;;  %vm1684_vm11 = vcmp.ge.s32.totalorder %v1672_v45, %v1678_v7 }
 0xa7e   :  { %vm1699_vm14 = vcmp.lt.s32.totalorder %v1676_v17, %v1689_v33  ;;  %vm1698_vm1 = vcmp.lt.s32.totalorder %v1675_v57, %v1689_v33  ;;  %vm1697_vm5 = vcmp.lt.s32.totalorder %v1674_v61, %v1689_v33  ;;  %vm1696_vm8 = vcmp.lt.s32.totalorder %v1673_v12, %v1689_v33 }
 0xa7f   :  { %vm1709_vm15 = vmand %vm1688_vm4, %vm1699_vm14  ;;  %vm1695_vm12 = vcmp.lt.s32.totalorder %v1672_v45, %v1689_v33  ;;  %vm1683_vm14 = vcmp.ge.s32.totalorder %v1671_v15, %v1678_v7 }
 0xa80   :  { %2207 = vmatmul.mubr.msk.bf16.vlgmr.msra.gmra.mxu1 %vm1102_vm9, %v2753_v63  ;;  %v1577_v63 = vld [vmem:[%s3004_s3 + $0xd8] sm:$0xff]  ;;  %2224 = vmatprep.subr.msk.mxu1 %vm1709_vm15, %v2366_v44  ;;  %vm1708_vm2 = vmand %vm1687_vm0, %vm1698_vm1  ;;  %vm1682_vm1 = vcmp.ge.s32.totalorder %v1670_v19, %v1678_v7 }
 0xa81   :  { %v1586_v37 = vpack.c.bf16 %v1577_v63, %v1576_v40  ;;  %2225 = vmatpush3.msk.msra.mxu1 %vm1709_vm15, %v2366_v44  ;;  %vm1707_vm6 = vmand %vm1686_vm3, %vm1697_vm5  ;;  %vm1694_vm15 = vcmp.lt.s32.totalorder %v1671_v15, %v1689_v33  ;;  %vm1681_vm5 = vcmp.ge.s32.totalorder %v1669_v49, %v1678_v7 }
 0xa82   :  { %2226 = vmatprep.subr.msk.mxu1 %vm1708_vm2, %v2366_v44  ;;  %vm1706_vm9 = vmand %vm1685_vm7, %vm1696_vm8  ;;  %vm1680_vm8 = vcmp.ge.s32.totalorder %v2742_v55, %v1678_v7 }
 0xa83   :  { %2219 = vmatpush3.bf16.msra.mxu0 %v1586_v37  ;;  %2227 = vmatpush3.msk.msra.mxu1 %vm1708_vm2, %v2366_v44  ;;  %vm1705_vm4 = vmand %vm1684_vm11, %vm1695_vm12  ;;  %vm1693_vm2 = vcmp.lt.s32.totalorder %v1670_v19, %v1689_v33  ;;  %vm1679_vm12 = vcmp.ge.s32.totalorder %v2578_v48, %v1678_v7 }
 0xa84   :  { %2228 = vmatprep.subr.msk.mxu1 %vm1707_vm6, %v2366_v44  ;;  %vm1704_vm0 = vmand %vm1683_vm14, %vm1694_vm15 }
 0xa85   :  { %2229 = vmatpush3.msk.msra.mxu1 %vm1707_vm6, %v2366_v44  ;;  %vm1703_vm3 = vmand %vm1682_vm1, %vm1693_vm2  ;;  %vm1692_vm6 = vcmp.lt.s32.totalorder %v1669_v49, %v1689_v33 }
 0xa86   :  { %2230 = vmatprep.subr.msk.mxu1 %vm1706_vm9, %v2366_v44  ;;  %vm1702_vm7 = vmand %vm1681_vm5, %vm1692_vm6 }
 0xa87   :  { %2231 = vmatpush3.msk.msra.mxu1 %vm1706_vm9, %v2366_v44  ;;  %vm1691_vm9 = vcmp.lt.s32.totalorder %v2742_v55, %v1689_v33 }
 0xa88   :  { %2232 = vmatprep.subr.msk.mxu1 %vm1705_vm4, %v2366_v44  ;;  %vm1701_vm11 = vmand %vm1680_vm8, %vm1691_vm9 }
 0xa89   :  { %2233 = vmatpush3.msk.msra.mxu1 %vm1705_vm4, %v2366_v44  ;;  %vm1690_vm4 = vcmp.lt.s32.totalorder %v2578_v48, %v1689_v33 }
 0xa8a   :  { %2234 = vmatprep.subr.msk.mxu1 %vm1704_vm0, %v2366_v44  ;;  %vm1700_vm14 = vmand %vm1679_vm12, %vm1690_vm4 }
 0xa8b   :  { %2235 = vmatpush3.msk.msra.mxu1 %vm1704_vm0, %v2366_v44 }
 0xa8c   :  { %2236 = vmatprep.subr.msk.mxu1 %vm1703_vm3, %v2366_v44 }
 0xa8d   :  { %2237 = vmatpush3.msk.msra.mxu1 %vm1703_vm3, %v2366_v44 }
 0xa8e   :  { %2238 = vmatprep.subr.msk.mxu1 %vm1702_vm7, %v2366_v44 }
 0xa8f   :  { %2239 = vmatpush3.msk.msra.mxu1 %vm1702_vm7, %v2366_v44 }
 0xa90   :  { %2240 = vmatprep.subr.msk.mxu1 %vm1701_vm11, %v2366_v44 }
 0xa91   :  { %2241 = vmatpush3.msk.msra.mxu1 %vm1701_vm11, %v2366_v44 }
 0xa92   :  { %2242 = vmatprep.subr.msk.mxu1 %vm1700_vm14, %v2366_v44 }
 0xa93   :  { %2243 = vmatpush3.msk.msra.mxu1 %vm1700_vm14, %v2366_v44 }
 0xb40   :  { %v1568_v39 = vpop.f32.mrf.mxu1 }
 0xb42   :  { %v2208_v1 = vpop.f32.mrf.mxu1 }
 0xb44   :  { %v1571_v42 = vpop.f32.mrf.mxu1 }
 0xb45   :  { %v1575_v59 = vpack.c.bf16 %v1571_v42, %v1568_v39 }
 0xb46   :  { %v2209_v43 = vpop.f32.mrf.mxu1 }
 0xb47   :  { %2221 = vmatmul.mubr.msk.bf16.vlgmr.msra.gmra.mxu0 %vm1163_vm10, %v1575_v59 }
 0xc07   :  { %v1628_v51 = vpop.f32.mrf.mxu0 }
 0xc08   :  { %v1910_v46 = vmul.f32 -1.442695, %v1628_v51 }
 0xc09   :  { %v2222_v4 = vpop.f32.mrf.mxu0 }
 0xc0a   :  { %2335 = vpow2.f32 %v1910_v46 }
 0xc0b   :  { %v1631_v25 = vpop.f32.mrf.mxu0 }
 0xc0c   :  { %v1911_v13 = vmul.f32 -1.442695, %v1631_v25 }
 0xc0d   :  { %v2223_v11 = vpop.f32.mrf.mxu0 }
 0xc0e   :  { %2337 = vpow2.f32 %v1911_v13 }
 0xc17   :  { %v2336_v55 = vpop.eup %2335 }
 0xc18   :  { %v1641_v20 = vadd.f32 1.0, %v2336_v55 }
 0xc1a   :  { %2339 = vrcp.f32 %v1641_v20 }
 0xc1b   :  { %v2338_v6 = vpop.eup %2337 }
 0xc1c   :  { %v1642_v22 = vadd.f32 1.0, %v2338_v6 }
 0xc1e   :  { %2341 = vrcp.f32 %v1642_v22 }
 0xc27   :  { %v2340_v24 = vpop.eup %2339 }
 0xc28   :  { %v1912_v48 = vadd.f32 -1.0, %v2340_v24 }
 0xc2a   :  { %v1649_v54 = vmul.f32 %v1912_v48, %v2783_v41 }
 0xc2b   :  { %v2342_v2 = vpop.eup %2341 }
 0xc2c   :  { %v1651_v26 = vadd.f32 1.0, %v1649_v54  ;;  %v1913_v27 = vadd.f32 -1.0, %v2342_v2 }
 0xc2e   :  { %v1653_v30 = vmul.f32 %v1651_v26, %v1628_v51  ;;  %v1650_v23 = vmul.f32 %v1913_v27, %v2783_v41  ;;  %v1818_v41 = vstv %s1828_s23 }
 0xc30   :  { %v1665_v5 = vmul.f32 %v1664_v29, %v1653_v30  ;;  %v1652_v52 = vadd.f32 1.0, %v1650_v23 }
 0xc32   :  { %v1667_v31 = vadd.f32 %v1665_v5, %v1659_v10  ;;  %v1654_v32 = vmul.f32 %v1652_v52, %v1631_v25 }
 0xc34   :  { %v1666_v56 = vmul.f32 %v1664_v29, %v1654_v32  ;;  %v1735_v35 = vmul.f32 %v1924_v3, %v1667_v31 }
 0xc36   :  { %v1668_v58 = vadd.f32 %v1666_v56, %v1660_v34  ;;  %2244 = vmatprep.mubr.msk.f32.mxu1 %vm1163_vm10, %v1735_v35 }
 0xc38   :  { %v1736_v8 = vmul.f32 %v1924_v3, %v1668_v58 }
 0xc3a   :  { %2245 = vmatmul.mubr.msk.f32.vlgmr.msra.gmra.mxu1 %vm1163_vm10, %v1736_v8 }
 0xcfa   :  { %v2246_v50 = vpop.f32.mrf.mxu1 }
 0xcfb   :  { %v1820_v38 = vmul.f32 %v2246_v50, %v1818_v41 }
 0xcfc   :  { %v1809_v9 = vpop.f32.mrf.mxu1 }
 0xcfd   :  { %1822 = vst.msk [vmem:[%s3005_s4 + $0x8] sm:$0xff] %vm277_vm13, %v1820_v38  ;;  %v1819_v53 = vmul.f32 %v1818_v41, %v1809_v9 }
 0xcff   :  { %1821 = vst.msk [vmem:[%s3005_s4] sm:$0xff] %vm277_vm13, %v1819_v53 }
 0xd00   :  { %1827 = vsyncpa [#allocation3], 1 }

</bundles_post_ra>
